<compile_context>
chip_gen: v7x
topology: tpu7x:2x2x1
jax: 0.10.0
libtpu: 0.0.40
codegen_flags: <defaults>
</compile_context>

<pallas_src>
import functools

import jax
import jax.numpy as jnp
from jax import lax
from jax.experimental import pallas as pl
from jax.experimental.pallas import tpu as pltpu

NUM_CHANNELS = 8
EPS = 1e-5
KSIZE = 5  # conv kernel size (padding = 2 -> "same")


def _largest_divisor(n, cap):
    best = 1
    for c in range(1, min(n, cap) + 1):
        if n % c == 0:
            best = c
    return best


# --------------------------------------------------------------------------
# Kernel 1: (optional BN+ReLU on the input) -> Conv1d(k=5, same) -> conv bias,
# plus per-block BatchNorm partial sums (sum and sum-of-squares over the block).
# The k=5 halo is built in a VMEM scratch slab (zero halo, no HBM padding).
# --------------------------------------------------------------------------
def conv_bn_stats_kernel(apply_bn, k_taps, x_ref, scale_ref, shift_ref, w_ref,
                         b_ref, y_ref, s_ref, ss_ref, xp_ref):
    # x_ref : (Nb, L, Cin)        input block (conv1: raw x, conv2: y1 pre-BN)
    # scale/shift : (1, Cin)      BN affine for the *input* (used iff apply_bn)
    # w_ref : (K, Cin, Cout), b_ref: (1, Cout)
    # y_ref : (Nb, L, Cout)       conv output (pre-BN)
    # s_ref / ss_ref : (1, Cout)  per-block partial sums over (Nb, L)
    # xp_ref: (Nb, L + K - 1, Cin) VMEM scratch: zero-padded input slab
    nb, seq, c_out = y_ref.shape
    c_in = x_ref.shape[2]
    halo = (k_taps - 1) // 2

    x = x_ref[...]
    if apply_bn:
        # BatchNorm affine + ReLU fused on the fly; h1 never touches HBM.
        x = jnp.maximum(x * scale_ref[0] + shift_ref[0], 0.0)

    # Zero-padded slab in VMEM (halo zeroed AFTER BN+ReLU, same as padding h1).
    xp_ref[:, :halo, :] = jnp.zeros((nb, halo, c_in), jnp.float32)
    xp_ref[:, halo + seq:, :] = jnp.zeros((nb, halo, c_in), jnp.float32)
    xp_ref[:, halo:halo + seq, :] = x

    # K statically-unrolled shifted-window matmuls on the MXU, flattened over
    # (Nb * L) rows so the matmul M-dim amortizes per-step overhead.
    acc = jnp.zeros((nb * seq, c_out), jnp.float32)
    for k in range(k_taps):
        xk = xp_ref[:, k:k + seq, :].reshape(nb * seq, c_in)
        acc = acc + jnp.dot(xk, w_ref[k], preferred_element_type=jnp.float32)
    acc = acc + b_ref[0]

    y_ref[...] = acc.reshape(nb, seq, c_out)
    # Per-block partial sums (reduced in the wrapper) -> grid stays 'parallel'.
    s_ref[0] = jnp.sum(acc, axis=0)
    ss_ref[0] = jnp.sum(acc * acc, axis=0)


def conv_bn_stats(x, scale, shift, w_kic, b, apply_bn):
    n, seq, c_in = x.shape
    k_taps, _, c_out = w_kic.shape
    nb = _largest_divisor(n, 8)       # batch elements per grid step
    g = n // nb
    b2 = b.reshape(1, c_out)
    kern = functools.partial(conv_bn_stats_kernel, apply_bn, k_taps)
    return pl.pallas_call(
        kern,
        out_shape=(jax.ShapeDtypeStruct((n, seq, c_out), jnp.float32),
                   jax.ShapeDtypeStruct((g, c_out), jnp.float32),
                   jax.ShapeDtypeStruct((g, c_out), jnp.float32)),
        grid=(g,),
        in_specs=[pl.BlockSpec((nb, seq, c_in), lambda i: (i, 0, 0)),
                  pl.BlockSpec((1, c_in), lambda i: (0, 0)),
                  pl.BlockSpec((1, c_in), lambda i: (0, 0)),
                  pl.BlockSpec((k_taps, c_in, c_out), lambda i: (0, 0, 0)),
                  pl.BlockSpec((1, c_out), lambda i: (0, 0))],
        out_specs=(pl.BlockSpec((nb, seq, c_out), lambda i: (i, 0, 0)),
                   pl.BlockSpec((1, c_out), lambda i: (i, 0)),
                   pl.BlockSpec((1, c_out), lambda i: (i, 0))),
        scratch_shapes=[pltpu.VMEM((nb, seq + k_taps - 1, c_in), jnp.float32)],
        compiler_params=pltpu.CompilerParams(dimension_semantics=("parallel",)),
    )(x, scale, shift, w_kic, b2)


# --------------------------------------------------------------------------
# Kernel 2: fused BN2 + ReLU + MaxPool1d.  The wrapper passes y2 through a free
# (N*Lout, pool, C) reshape view so the pool is a single sublane max and the
# pooled result is written with one bulk store (no per-row masked stores).
# --------------------------------------------------------------------------
def bn_relu_pool_kernel(y_ref, scale_ref, shift_ref, feat_ref, out_ref):
    # y_ref/feat_ref: (Rb, pool, C); out_ref: (Rb, C)
    h = jnp.maximum(y_ref[...] * scale_ref[0] + shift_ref[0], 0.0)
    feat_ref[...] = h
    out_ref[...] = jnp.max(h, axis=1)


def bn_relu_pool(y, scale, shift, pool):
    n, seq, c = y.shape
    l_out = seq // pool
    rows = n * l_out
    y3 = y.reshape(rows, pool, c)     # free row-major view in HBM
    rb = _largest_divisor(rows, 512)  # rows per grid step
    g = rows // rb
    feat3, pooled2 = pl.pallas_call(
        bn_relu_pool_kernel,
        out_shape=(jax.ShapeDtypeStruct((rows, pool, c), jnp.float32),
                   jax.ShapeDtypeStruct((rows, c), jnp.float32)),
        grid=(g,),
        in_specs=[pl.BlockSpec((rb, pool, c), lambda i: (i, 0, 0)),
                  pl.BlockSpec((1, c), lambda i: (0, 0)),
                  pl.BlockSpec((1, c), lambda i: (0, 0))],
        out_specs=(pl.BlockSpec((rb, pool, c), lambda i: (i, 0, 0)),
                   pl.BlockSpec((rb, c), lambda i: (i, 0))),
        compiler_params=pltpu.CompilerParams(dimension_semantics=("parallel",)),
    )(y3, scale, shift)
    return feat3.reshape(n, seq, c), pooled2.reshape(n, l_out, c)


# --------------------------------------------------------------------------
# Full EncoderLayer forward (wrapper: layout transposes + turning partial batch
# statistics into BN scale/shift vectors).
# --------------------------------------------------------------------------
@functools.partial(jax.jit, static_argnames=("maxpool",))
def encoder_layer_forward(x_ncl, params, maxpool=10):
    x = jnp.transpose(x_ncl, (0, 2, 1))  # NCL -> NLC
    n, seq, c_in = x.shape
    cnt = float(n * seq)
    c_mid = params["w1"].shape[2]

    ones_in = jnp.ones((1, c_in), jnp.float32)
    zeros_in = jnp.zeros((1, c_in), jnp.float32)

    def bn_affine(s_part, ss_part, gamma, beta):
        s = jnp.sum(s_part, axis=0)
        ss = jnp.sum(ss_part, axis=0)
        mean = s / cnt
        var = ss / cnt - mean ** 2      # biased var (BN training forward)
        scale = gamma / jnp.sqrt(var + EPS)
        shift = beta - mean * scale
        return scale.reshape(1, -1), shift.reshape(1, -1)

    # pass 1: conv1 + batch-stat partials
    y1, s1p, ss1p = conv_bn_stats(x, ones_in, zeros_in,
                                  params["w1"], params["b1"], apply_bn=False)
    scale1, shift1 = bn_affine(s1p, ss1p, params["g1"], params["be1"])

    # pass 2: BN1 + ReLU fused into conv2 (+ batch-stat partials)
    y2, s2p, ss2p = conv_bn_stats(y1, scale1, shift1,
                                  params["w2"], params["b2"], apply_bn=True)
    scale2, shift2 = bn_affine(s2p, ss2p, params["g2"], params["be2"])

    # pass 3: BN2 + ReLU + MaxPool (fused, vectorized pool)
    # TODO(synk): handle L % maxpool != 0 (PyTorch MaxPool1d floors the length).
    assert seq % maxpool == 0, "fused pool path requires L % maxpool == 0"
    feat, pooled = bn_relu_pool(y2, scale2, shift2, maxpool)

    # back to PyTorch NCL layout: (output, output_features)
    return jnp.transpose(pooled, (0, 2, 1)), jnp.transpose(feat, (0, 2, 1))


# --------------------------------------------------------------------------
# Deterministic parameter initialization (shapes from the module's __init__).
# Conv weights are stored as (K, Cin, Cout) for the channels-last kernels.
# --------------------------------------------------------------------------
def init_params(key, cf=1):
    c_in = NUM_CHANNELS * cf
    c_mid = c_in * 2
    ks = jax.random.split(key, 8)
    sc1 = 1.0 / (c_in * KSIZE) ** 0.5
    sc2 = 1.0 / (c_mid * KSIZE) ** 0.5
    return dict(
        w1=jax.random.normal(ks[0], (KSIZE, c_in, c_mid), jnp.float32) * sc1,
        b1=jax.random.normal(ks[1], (c_mid,), jnp.float32) * sc1,
        g1=1.0 + 0.1 * jax.random.normal(ks[2], (c_mid,), jnp.float32),
        be1=0.1 * jax.random.normal(ks[3], (c_mid,), jnp.float32),
        w2=jax.random.normal(ks[4], (KSIZE, c_mid, c_mid), jnp.float32) * sc2,
        b2=jax.random.normal(ks[5], (c_mid,), jnp.float32) * sc2,
        g2=1.0 + 0.1 * jax.random.normal(ks[6], (c_mid,), jnp.float32),
        be2=0.1 * jax.random.normal(ks[7], (c_mid,), jnp.float32),
    )


# --------------------------------------------------------------------------
# Pure-JAX reference (mirrors PyTorch NCL semantics) for validation.
# --------------------------------------------------------------------------
def ref_forward(x_ncl, params, maxpool=10):
    def conv(x, w_kic, b):
        w_oik = jnp.transpose(w_kic, (2, 1, 0))  # -> (Cout, Cin, K)
        y = lax.conv_general_dilated(x, w_oik, (1,), [(2, 2)],
                                     dimension_numbers=("NCH", "OIH", "NCH"))
        return y + b[None, :, None]

    def bnr(x, g, be):
        mean = x.mean(axis=(0, 2), keepdims=True)
        var = ((x - mean) ** 2).mean(axis=(0, 2), keepdims=True)
        xn = (x - mean) / jnp.sqrt(var + EPS)
        return jnp.maximum(xn * g[None, :, None] + be[None, :, None], 0.0)

    h = bnr(conv(x_ncl, params["w1"], params["b1"]), params["g1"], params["be1"])
    feat = bnr(conv(h, params["w2"], params["b2"]), params["g2"], params["be2"])
    n, c, seq = feat.shape
    pooled = feat[:, :, :(seq // maxpool) * maxpool].reshape(
        n, c, seq // maxpool, maxpool).max(axis=-1)
    return pooled, feat


if __name__ == "__main__":
    key = jax.random.PRNGKey(0)
    k_x, k_p = jax.random.split(key)

    N, L, maxpool, cf = 2, 40, 10, 1
    C_in = NUM_CHANNELS * cf
    x = jax.random.normal(k_x, (N, C_in, L), jnp.float32)  # PyTorch NCL input
    params = init_params(k_p, cf=cf)

    out, feat = encoder_layer_forward(x, params, maxpool=maxpool)
    out = jax.block_until_ready(out)
    feat = jax.block_until_ready(feat)

    out_ref, feat_ref = ref_forward(x, params, maxpool=maxpool)

    assert out.shape == (N, C_in * 2, L // maxpool), out.shape
    assert feat.shape == (N, C_in * 2, L), feat.shape
    assert jnp.allclose(out, out_ref, atol=1e-3, rtol=1e-3)
    assert jnp.allclose(feat, feat_ref, atol=1e-3, rtol=1e-3)

    print("KERNEL_OK")
</pallas_src>

<mosaic_0001>
module attributes {stable_mosaic.version = 11 : i64} {
  func.func @conv_bn_stats_kernel(%arg0: i32, %arg1: memref<2x40x8xf32, #tpu.memory_space<vmem>>, %arg2: memref<1x8xf32, #tpu.memory_space<vmem>>, %arg3: memref<1x8xf32, #tpu.memory_space<vmem>>, %arg4: memref<5x8x16xf32, #tpu.memory_space<vmem>>, %arg5: memref<1x16xf32, #tpu.memory_space<vmem>>, %arg6: memref<2x40x16xf32, #tpu.memory_space<vmem>>, %arg7: memref<1x16xf32, #tpu.memory_space<vmem>>, %arg8: memref<1x16xf32, #tpu.memory_space<vmem>>, %arg9: memref<2x44x8xf32, #tpu.memory_space<vmem>>) attributes {dimension_semantics = [#tpu.dimension_semantics<parallel>], iteration_bounds = array<i64: 1>, scalar_prefetch = 0 : i64, scratch_operands = 1 : i64, tpu.core_type = #tpu.core_type<tc>, window_params = [{transform_indices = @transform_0, window_bounds = array<i64: 2, 40, 8>}, {pipeline_mode = #tpu.pipeline_mode<synchronous>, transform_indices = @transform_1, window_bounds = array<i64: 1, 8>}, {pipeline_mode = #tpu.pipeline_mode<synchronous>, transform_indices = @transform_2, window_bounds = array<i64: 1, 8>}, {pipeline_mode = #tpu.pipeline_mode<synchronous>, transform_indices = @transform_3, window_bounds = array<i64: 5, 8, 16>}, {pipeline_mode = #tpu.pipeline_mode<synchronous>, transform_indices = @transform_4, window_bounds = array<i64: 1, 16>}, {transform_indices = @transform_5, window_bounds = array<i64: 2, 40, 16>}, {transform_indices = @transform_6, window_bounds = array<i64: 1, 16>}, {transform_indices = @transform_7, window_bounds = array<i64: 1, 16>}]} {
    %c0 = arith.constant 0 : index
    %c0_0 = arith.constant 0 : index
    %c0_1 = arith.constant 0 : index
    %0 = vector.load %arg1[%c0, %c0_0, %c0_1] : memref<2x40x8xf32, #tpu.memory_space<vmem>>, vector<2x40x8xf32>
    %cst = arith.constant 0.000000e+00 : f32
    %1 = vector.broadcast %cst : f32 to vector<2x2x8xf32>
    %c0_2 = arith.constant 0 : index
    %c0_3 = arith.constant 0 : index
    %c0_4 = arith.constant 0 : index
    %2 = vector.load %arg9[%c0_2, %c0_3, %c0_4] : memref<2x44x8xf32, #tpu.memory_space<vmem>>, vector<2x2x8xf32>
    tpu.vector_store %arg9[%c0_2, %c0_3, %c0_4], %1 {strides = array<i32>} : memref<2x44x8xf32, #tpu.memory_space<vmem>>, vector<2x2x8xf32>,
    %cst_5 = arith.constant 0.000000e+00 : f32
    %3 = vector.broadcast %cst_5 : f32 to vector<2x2x8xf32>
    %c0_6 = arith.constant 0 : index
    %c42 = arith.constant 42 : index
    %c0_7 = arith.constant 0 : index
    %4 = vector.load %arg9[%c0_6, %c42, %c0_7] : memref<2x44x8xf32, #tpu.memory_space<vmem>>, vector<2x2x8xf32>
    tpu.vector_store %arg9[%c0_6, %c42, %c0_7], %3 {strides = array<i32>} : memref<2x44x8xf32, #tpu.memory_space<vmem>>, vector<2x2x8xf32>,
    %c0_8 = arith.constant 0 : index
    %c2 = arith.constant 2 : index
    %c0_9 = arith.constant 0 : index
    %5 = vector.load %arg9[%c0_8, %c2, %c0_9] : memref<2x44x8xf32, #tpu.memory_space<vmem>>, vector<2x40x8xf32>
    tpu.vector_store %arg9[%c0_8, %c2, %c0_9], %0 {strides = array<i32>} : memref<2x44x8xf32, #tpu.memory_space<vmem>>, vector<2x40x8xf32>,
    %cst_10 = arith.constant 0.000000e+00 : f32
    %6 = vector.broadcast %cst_10 : f32 to vector<80x16xf32>
    %c0_11 = arith.constant 0 : index
    %c0_12 = arith.constant 0 : index
    %c0_13 = arith.constant 0 : index
    %7 = vector.load %arg9[%c0_11, %c0_12, %c0_13] : memref<2x44x8xf32, #tpu.memory_space<vmem>>, vector<2x40x8xf32>
    %8 = vector.shape_cast %7 : vector<2x40x8xf32> to vector<80x8xf32>
    %c0_14 = arith.constant 0 : index
    %c0_15 = arith.constant 0 : index
    %c0_16 = arith.constant 0 : index
    %9 = vector.load %arg4[%c0_14, %c0_15, %c0_16] : memref<5x8x16xf32, #tpu.memory_space<vmem>>, vector<1x8x16xf32>
    %10 = vector.shape_cast %9 : vector<1x8x16xf32> to vector<8x16xf32>
    %cst_17 = arith.constant dense<0.000000e+00> : vector<80x16xf32>
    %11 = tpu.matmul %8, %10, %cst_17 {dimension_numbers = #tpu.dot_dimension_numbers<[1], [0], [0], [1], [0, 0, 1, 1], [], []>} : vector<80x8xf32>, vector<8x16xf32>, vector<80x16xf32> -> vector<80x16xf32>
    %12 = arith.addf %6, %11 : vector<80x16xf32>
    %c0_18 = arith.constant 0 : index
    %c1 = arith.constant 1 : index
    %c0_19 = arith.constant 0 : index
    %13 = vector.load %arg9[%c0_18, %c1, %c0_19] : memref<2x44x8xf32, #tpu.memory_space<vmem>>, vector<2x40x8xf32>
    %14 = vector.shape_cast %13 : vector<2x40x8xf32> to vector<80x8xf32>
    %c1_20 = arith.constant 1 : index
    %c0_21 = arith.constant 0 : index
    %c0_22 = arith.constant 0 : index
    %15 = vector.load %arg4[%c1_20, %c0_21, %c0_22] : memref<5x8x16xf32, #tpu.memory_space<vmem>>, vector<1x8x16xf32>
    %16 = vector.shape_cast %15 : vector<1x8x16xf32> to vector<8x16xf32>
    %cst_23 = arith.constant dense<0.000000e+00> : vector<80x16xf32>
    %17 = tpu.matmul %14, %16, %cst_23 {dimension_numbers = #tpu.dot_dimension_numbers<[1], [0], [0], [1], [0, 0, 1, 1], [], []>} : vector<80x8xf32>, vector<8x16xf32>, vector<80x16xf32> -> vector<80x16xf32>
    %18 = arith.addf %12, %17 : vector<80x16xf32>
    %c0_24 = arith.constant 0 : index
    %c2_25 = arith.constant 2 : index
    %c0_26 = arith.constant 0 : index
    %19 = vector.load %arg9[%c0_24, %c2_25, %c0_26] : memref<2x44x8xf32, #tpu.memory_space<vmem>>, vector<2x40x8xf32>
    %20 = vector.shape_cast %19 : vector<2x40x8xf32> to vector<80x8xf32>
    %c2_27 = arith.constant 2 : index
    %c0_28 = arith.constant 0 : index
    %c0_29 = arith.constant 0 : index
    %21 = vector.load %arg4[%c2_27, %c0_28, %c0_29] : memref<5x8x16xf32, #tpu.memory_space<vmem>>, vector<1x8x16xf32>
    %22 = vector.shape_cast %21 : vector<1x8x16xf32> to vector<8x16xf32>
    %cst_30 = arith.constant dense<0.000000e+00> : vector<80x16xf32>
    %23 = tpu.matmul %20, %22, %cst_30 {dimension_numbers = #tpu.dot_dimension_numbers<[1], [0], [0], [1], [0, 0, 1, 1], [], []>} : vector<80x8xf32>, vector<8x16xf32>, vector<80x16xf32> -> vector<80x16xf32>
    %24 = arith.addf %18, %23 : vector<80x16xf32>
    %c0_31 = arith.constant 0 : index
    %c3 = arith.constant 3 : index
    %c0_32 = arith.constant 0 : index
    %25 = vector.load %arg9[%c0_31, %c3, %c0_32] : memref<2x44x8xf32, #tpu.memory_space<vmem>>, vector<2x40x8xf32>
    %26 = vector.shape_cast %25 : vector<2x40x8xf32> to vector<80x8xf32>
    %c3_33 = arith.constant 3 : index
    %c0_34 = arith.constant 0 : index
    %c0_35 = arith.constant 0 : index
    %27 = vector.load %arg4[%c3_33, %c0_34, %c0_35] : memref<5x8x16xf32, #tpu.memory_space<vmem>>, vector<1x8x16xf32>
    %28 = vector.shape_cast %27 : vector<1x8x16xf32> to vector<8x16xf32>
    %cst_36 = arith.constant dense<0.000000e+00> : vector<80x16xf32>
    %29 = tpu.matmul %26, %28, %cst_36 {dimension_numbers = #tpu.dot_dimension_numbers<[1], [0], [0], [1], [0, 0, 1, 1], [], []>} : vector<80x8xf32>, vector<8x16xf32>, vector<80x16xf32> -> vector<80x16xf32>
    %30 = arith.addf %24, %29 : vector<80x16xf32>
    %c0_37 = arith.constant 0 : index
    %c4 = arith.constant 4 : index
    %c0_38 = arith.constant 0 : index
    %31 = vector.load %arg9[%c0_37, %c4, %c0_38] : memref<2x44x8xf32, #tpu.memory_space<vmem>>, vector<2x40x8xf32>
    %32 = vector.shape_cast %31 : vector<2x40x8xf32> to vector<80x8xf32>
    %c4_39 = arith.constant 4 : index
    %c0_40 = arith.constant 0 : index
    %c0_41 = arith.constant 0 : index
    %33 = vector.load %arg4[%c4_39, %c0_40, %c0_41] : memref<5x8x16xf32, #tpu.memory_space<vmem>>, vector<1x8x16xf32>
    %34 = vector.shape_cast %33 : vector<1x8x16xf32> to vector<8x16xf32>
    %cst_42 = arith.constant dense<0.000000e+00> : vector<80x16xf32>
    %35 = tpu.matmul %32, %34, %cst_42 {dimension_numbers = #tpu.dot_dimension_numbers<[1], [0], [0], [1], [0, 0, 1, 1], [], []>} : vector<80x8xf32>, vector<8x16xf32>, vector<80x16xf32> -> vector<80x16xf32>
    %36 = arith.addf %30, %35 : vector<80x16xf32>
    %c0_43 = arith.constant 0 : index
    %c0_44 = arith.constant 0 : index
    %37 = vector.load %arg5[%c0_43, %c0_44] : memref<1x16xf32, #tpu.memory_space<vmem>>, vector<1x16xf32>
    %38 = vector.shape_cast %37 : vector<1x16xf32> to vector<16xf32>
    %39 = vector.shape_cast %38 : vector<16xf32> to vector<1x16xf32>
    %40 = vector.broadcast %39 : vector<1x16xf32> to vector<80x16xf32>
    %41 = arith.addf %36, %40 : vector<80x16xf32>
    %42 = vector.shape_cast %41 : vector<80x16xf32> to vector<2x40x16xf32>
    %c0_45 = arith.constant 0 : index
    %c0_46 = arith.constant 0 : index
    %c0_47 = arith.constant 0 : index
    %43 = vector.load %arg6[%c0_45, %c0_46, %c0_47] : memref<2x40x16xf32, #tpu.memory_space<vmem>>, vector<2x40x16xf32>
    tpu.vector_store %arg6[%c0_45, %c0_46, %c0_47], %42 {strides = array<i32>} : memref<2x40x16xf32, #tpu.memory_space<vmem>>, vector<2x40x16xf32>,
    %cst_48 = arith.constant dense<0.000000e+00> : vector<16xf32>
    %44 = vector.multi_reduction <add>, %41, %cst_48 [0] : vector<80x16xf32> to vector<16xf32>
    %c0_49 = arith.constant 0 : index
    %c0_50 = arith.constant 0 : index
    %45 = vector.load %arg7[%c0_49, %c0_50] : memref<1x16xf32, #tpu.memory_space<vmem>>, vector<1x16xf32>
    %46 = vector.shape_cast %45 : vector<1x16xf32> to vector<16xf32>
    %47 = vector.shape_cast %44 : vector<16xf32> to vector<1x16xf32>
    tpu.vector_store %arg7[%c0_49, %c0_50], %47 {strides = array<i32>} : memref<1x16xf32, #tpu.memory_space<vmem>>, vector<1x16xf32>,
    %48 = arith.mulf %41, %41 : vector<80x16xf32>
    %cst_51 = arith.constant dense<0.000000e+00> : vector<16xf32>
    %49 = vector.multi_reduction <add>, %48, %cst_51 [0] : vector<80x16xf32> to vector<16xf32>
    %c0_52 = arith.constant 0 : index
    %c0_53 = arith.constant 0 : index
    %50 = vector.load %arg8[%c0_52, %c0_53] : memref<1x16xf32, #tpu.memory_space<vmem>>, vector<1x16xf32>
    %51 = vector.shape_cast %50 : vector<1x16xf32> to vector<16xf32>
    %52 = vector.shape_cast %49 : vector<16xf32> to vector<1x16xf32>
    tpu.vector_store %arg8[%c0_52, %c0_53], %52 {strides = array<i32>} : memref<1x16xf32, #tpu.memory_space<vmem>>, vector<1x16xf32>,
    return
  }
  func.func @transform_0(%arg0: i32) -> (i32, i32, i32) {
    %c0_i32 = arith.constant 0 : i32
    %c0_i32_0 = arith.constant 0 : i32
    %c0_i32_1 = arith.constant 0 : i32
    return %arg0, %c0_i32, %c0_i32_0 : i32, i32, i32
  }
  func.func @transform_1(%arg0: i32) -> (i32, i32) {
    %c0_i32 = arith.constant 0 : i32
    %c0_i32_0 = arith.constant 0 : i32
    %c0_i32_1 = arith.constant 0 : i32
    return %c0_i32, %c0_i32_0 : i32, i32
  }
  func.func @transform_2(%arg0: i32) -> (i32, i32) {
    %c0_i32 = arith.constant 0 : i32
    %c0_i32_0 = arith.constant 0 : i32
    %c0_i32_1 = arith.constant 0 : i32
    return %c0_i32, %c0_i32_0 : i32, i32
  }
  func.func @transform_3(%arg0: i32) -> (i32, i32, i32) {
    %c0_i32 = arith.constant 0 : i32
    %c0_i32_0 = arith.constant 0 : i32
    %c0_i32_1 = arith.constant 0 : i32
    %c0_i32_2 = arith.constant 0 : i32
    return %c0_i32, %c0_i32_0, %c0_i32_1 : i32, i32, i32
  }
  func.func @transform_4(%arg0: i32) -> (i32, i32) {
    %c0_i32 = arith.constant 0 : i32
    %c0_i32_0 = arith.constant 0 : i32
    %c0_i32_1 = arith.constant 0 : i32
    return %c0_i32, %c0_i32_0 : i32, i32
  }
  func.func @transform_5(%arg0: i32) -> (i32, i32, i32) {
    %c0_i32 = arith.constant 0 : i32
    %c0_i32_0 = arith.constant 0 : i32
    %c0_i32_1 = arith.constant 0 : i32
    return %arg0, %c0_i32, %c0_i32_0 : i32, i32, i32
  }
  func.func @transform_6(%arg0: i32) -> (i32, i32) {
    %c0_i32 = arith.constant 0 : i32
    %c0_i32_0 = arith.constant 0 : i32
    return %arg0, %c0_i32 : i32, i32
  }
  func.func @transform_7(%arg0: i32) -> (i32, i32) {
    %c0_i32 = arith.constant 0 : i32
    %c0_i32_0 = arith.constant 0 : i32
    return %arg0, %c0_i32 : i32, i32
  }
}

module attributes {stable_mosaic.version = 11 : i64} {
  func.func @bn_relu_pool_kernel(%arg0: i32, %arg1: memref<8x10x16xf32, #tpu.memory_space<vmem>>, %arg2: memref<1x16xf32, #tpu.memory_space<vmem>>, %arg3: memref<1x16xf32, #tpu.memory_space<vmem>>, %arg4: memref<8x10x16xf32, #tpu.memory_space<vmem>>, %arg5: memref<8x16xf32, #tpu.memory_space<vmem>>) attributes {dimension_semantics = [#tpu.dimension_semantics<parallel>], iteration_bounds = array<i64: 1>, scalar_prefetch = 0 : i64, scratch_operands = 0 : i64, tpu.core_type = #tpu.core_type<tc>, window_params = [{transform_indices = @transform_0, window_bounds = array<i64: 8, 10, 16>}, {pipeline_mode = #tpu.pipeline_mode<synchronous>, transform_indices = @transform_1, window_bounds = array<i64: 1, 16>}, {pipeline_mode = #tpu.pipeline_mode<synchronous>, transform_indices = @transform_2, window_bounds = array<i64: 1, 16>}, {transform_indices = @transform_3, window_bounds = array<i64: 8, 10, 16>}, {transform_indices = @transform_4, window_bounds = array<i64: 8, 16>}]} {
    %c0 = arith.constant 0 : index
    %c0_0 = arith.constant 0 : index
    %c0_1 = arith.constant 0 : index
    %0 = vector.load %arg1[%c0, %c0_0, %c0_1] : memref<8x10x16xf32, #tpu.memory_space<vmem>>, vector<8x10x16xf32>
    %c0_2 = arith.constant 0 : index
    %c0_3 = arith.constant 0 : index
    %1 = vector.load %arg2[%c0_2, %c0_3] : memref<1x16xf32, #tpu.memory_space<vmem>>, vector<1x16xf32>
    %2 = vector.shape_cast %1 : vector<1x16xf32> to vector<16xf32>
    %3 = vector.shape_cast %2 : vector<16xf32> to vector<1x1x16xf32>
    %4 = vector.broadcast %3 : vector<1x1x16xf32> to vector<8x10x16xf32>
    %5 = arith.mulf %0, %4 : vector<8x10x16xf32>
    %c0_4 = arith.constant 0 : index
    %c0_5 = arith.constant 0 : index
    %6 = vector.load %arg3[%c0_4, %c0_5] : memref<1x16xf32, #tpu.memory_space<vmem>>, vector<1x16xf32>
    %7 = vector.shape_cast %6 : vector<1x16xf32> to vector<16xf32>
    %8 = vector.shape_cast %7 : vector<16xf32> to vector<1x1x16xf32>
    %9 = vector.broadcast %8 : vector<1x1x16xf32> to vector<8x10x16xf32>
    %10 = arith.addf %5, %9 : vector<8x10x16xf32>
    %cst = arith.constant 0.000000e+00 : f32
    %11 = vector.broadcast %cst : f32 to vector<8x10x16xf32>
    %12 = arith.maximumf %10, %11 : vector<8x10x16xf32>
    %c0_6 = arith.constant 0 : index
    %c0_7 = arith.constant 0 : index
    %c0_8 = arith.constant 0 : index
    %13 = vector.load %arg4[%c0_6, %c0_7, %c0_8] : memref<8x10x16xf32, #tpu.memory_space<vmem>>, vector<8x10x16xf32>
    tpu.vector_store %arg4[%c0_6, %c0_7, %c0_8], %12 {strides = array<i32>} : memref<8x10x16xf32, #tpu.memory_space<vmem>>, vector<8x10x16xf32>,
    %cst_9 = arith.constant dense<0xFF800000> : vector<8x16xf32>
    %14 = vector.multi_reduction <maximumf>, %12, %cst_9 [1] : vector<8x10x16xf32> to vector<8x16xf32>
    %c0_10 = arith.constant 0 : index
    %c0_11 = arith.constant 0 : index
    %15 = vector.load %arg5[%c0_10, %c0_11] : memref<8x16xf32, #tpu.memory_space<vmem>>, vector<8x16xf32>
    tpu.vector_store %arg5[%c0_10, %c0_11], %14 {strides = array<i32>} : memref<8x16xf32, #tpu.memory_space<vmem>>, vector<8x16xf32>,
    return
  }
  func.func @transform_0(%arg0: i32) -> (i32, i32, i32) {
    %c0_i32 = arith.constant 0 : i32
    %c0_i32_0 = arith.constant 0 : i32
    %c0_i32_1 = arith.constant 0 : i32
    return %arg0, %c0_i32, %c0_i32_0 : i32, i32, i32
  }
  func.func @transform_1(%arg0: i32) -> (i32, i32) {
    %c0_i32 = arith.constant 0 : i32
    %c0_i32_0 = arith.constant 0 : i32
    %c0_i32_1 = arith.constant 0 : i32
    return %c0_i32, %c0_i32_0 : i32, i32
  }
  func.func @transform_2(%arg0: i32) -> (i32, i32) {
    %c0_i32 = arith.constant 0 : i32
    %c0_i32_0 = arith.constant 0 : i32
    %c0_i32_1 = arith.constant 0 : i32
    return %c0_i32, %c0_i32_0 : i32, i32
  }
  func.func @transform_3(%arg0: i32) -> (i32, i32, i32) {
    %c0_i32 = arith.constant 0 : i32
    %c0_i32_0 = arith.constant 0 : i32
    %c0_i32_1 = arith.constant 0 : i32
    return %arg0, %c0_i32, %c0_i32_0 : i32, i32, i32
  }
  func.func @transform_4(%arg0: i32) -> (i32, i32) {
    %c0_i32 = arith.constant 0 : i32
    %c0_i32_0 = arith.constant 0 : i32
    return %arg0, %c0_i32 : i32, i32
  }
}

module attributes {stable_mosaic.version = 11 : i64} {
  func.func @conv_bn_stats_kernel(%arg0: i32, %arg1: memref<2x40x16xf32, #tpu.memory_space<vmem>>, %arg2: memref<1x16xf32, #tpu.memory_space<vmem>>, %arg3: memref<1x16xf32, #tpu.memory_space<vmem>>, %arg4: memref<5x16x16xf32, #tpu.memory_space<vmem>>, %arg5: memref<1x16xf32, #tpu.memory_space<vmem>>, %arg6: memref<2x40x16xf32, #tpu.memory_space<vmem>>, %arg7: memref<1x16xf32, #tpu.memory_space<vmem>>, %arg8: memref<1x16xf32, #tpu.memory_space<vmem>>, %arg9: memref<2x44x16xf32, #tpu.memory_space<vmem>>) attributes {dimension_semantics = [#tpu.dimension_semantics<parallel>], iteration_bounds = array<i64: 1>, scalar_prefetch = 0 : i64, scratch_operands = 1 : i64, tpu.core_type = #tpu.core_type<tc>, window_params = [{transform_indices = @transform_0, window_bounds = array<i64: 2, 40, 16>}, {pipeline_mode = #tpu.pipeline_mode<synchronous>, transform_indices = @transform_1, window_bounds = array<i64: 1, 16>}, {pipeline_mode = #tpu.pipeline_mode<synchronous>, transform_indices = @transform_2, window_bounds = array<i64: 1, 16>}, {pipeline_mode = #tpu.pipeline_mode<synchronous>, transform_indices = @transform_3, window_bounds = array<i64: 5, 16, 16>}, {pipeline_mode = #tpu.pipeline_mode<synchronous>, transform_indices = @transform_4, window_bounds = array<i64: 1, 16>}, {transform_indices = @transform_5, window_bounds = array<i64: 2, 40, 16>}, {transform_indices = @transform_6, window_bounds = array<i64: 1, 16>}, {transform_indices = @transform_7, window_bounds = array<i64: 1, 16>}]} {
    %c0 = arith.constant 0 : index
    %c0_0 = arith.constant 0 : index
    %c0_1 = arith.constant 0 : index
    %0 = vector.load %arg1[%c0, %c0_0, %c0_1] : memref<2x40x16xf32, #tpu.memory_space<vmem>>, vector<2x40x16xf32>
    %c0_2 = arith.constant 0 : index
    %c0_3 = arith.constant 0 : index
    %1 = vector.load %arg2[%c0_2, %c0_3] : memref<1x16xf32, #tpu.memory_space<vmem>>, vector<1x16xf32>
    %2 = vector.shape_cast %1 : vector<1x16xf32> to vector<16xf32>
    %3 = vector.shape_cast %2 : vector<16xf32> to vector<1x1x16xf32>
    %4 = vector.broadcast %3 : vector<1x1x16xf32> to vector<2x40x16xf32>
    %5 = arith.mulf %0, %4 : vector<2x40x16xf32>
    %c0_4 = arith.constant 0 : index
    %c0_5 = arith.constant 0 : index
    %6 = vector.load %arg3[%c0_4, %c0_5] : memref<1x16xf32, #tpu.memory_space<vmem>>, vector<1x16xf32>
    %7 = vector.shape_cast %6 : vector<1x16xf32> to vector<16xf32>
    %8 = vector.shape_cast %7 : vector<16xf32> to vector<1x1x16xf32>
    %9 = vector.broadcast %8 : vector<1x1x16xf32> to vector<2x40x16xf32>
    %10 = arith.addf %5, %9 : vector<2x40x16xf32>
    %cst = arith.constant 0.000000e+00 : f32
    %11 = vector.broadcast %cst : f32 to vector<2x40x16xf32>
    %12 = arith.maximumf %10, %11 : vector<2x40x16xf32>
    %cst_6 = arith.constant 0.000000e+00 : f32
    %13 = vector.broadcast %cst_6 : f32 to vector<2x2x16xf32>
    %c0_7 = arith.constant 0 : index
    %c0_8 = arith.constant 0 : index
    %c0_9 = arith.constant 0 : index
    %14 = vector.load %arg9[%c0_7, %c0_8, %c0_9] : memref<2x44x16xf32, #tpu.memory_space<vmem>>, vector<2x2x16xf32>
    tpu.vector_store %arg9[%c0_7, %c0_8, %c0_9], %13 {strides = array<i32>} : memref<2x44x16xf32, #tpu.memory_space<vmem>>, vector<2x2x16xf32>,
    %cst_10 = arith.constant 0.000000e+00 : f32
    %15 = vector.broadcast %cst_10 : f32 to vector<2x2x16xf32>
    %c0_11 = arith.constant 0 : index
    %c42 = arith.constant 42 : index
    %c0_12 = arith.constant 0 : index
    %16 = vector.load %arg9[%c0_11, %c42, %c0_12] : memref<2x44x16xf32, #tpu.memory_space<vmem>>, vector<2x2x16xf32>
    tpu.vector_store %arg9[%c0_11, %c42, %c0_12], %15 {strides = array<i32>} : memref<2x44x16xf32, #tpu.memory_space<vmem>>, vector<2x2x16xf32>,
    %c0_13 = arith.constant 0 : index
    %c2 = arith.constant 2 : index
    %c0_14 = arith.constant 0 : index
    %17 = vector.load %arg9[%c0_13, %c2, %c0_14] : memref<2x44x16xf32, #tpu.memory_space<vmem>>, vector<2x40x16xf32>
    tpu.vector_store %arg9[%c0_13, %c2, %c0_14], %12 {strides = array<i32>} : memref<2x44x16xf32, #tpu.memory_space<vmem>>, vector<2x40x16xf32>,
    %cst_15 = arith.constant 0.000000e+00 : f32
    %18 = vector.broadcast %cst_15 : f32 to vector<80x16xf32>
    %c0_16 = arith.constant 0 : index
    %c0_17 = arith.constant 0 : index
    %c0_18 = arith.constant 0 : index
    %19 = vector.load %arg9[%c0_16, %c0_17, %c0_18] : memref<2x44x16xf32, #tpu.memory_space<vmem>>, vector<2x40x16xf32>
    %20 = vector.shape_cast %19 : vector<2x40x16xf32> to vector<80x16xf32>
    %c0_19 = arith.constant 0 : index
    %c0_20 = arith.constant 0 : index
    %c0_21 = arith.constant 0 : index
    %21 = vector.load %arg4[%c0_19, %c0_20, %c0_21] : memref<5x16x16xf32, #tpu.memory_space<vmem>>, vector<1x16x16xf32>
    %22 = vector.shape_cast %21 : vector<1x16x16xf32> to vector<16x16xf32>
    %cst_22 = arith.constant dense<0.000000e+00> : vector<80x16xf32>
    %23 = tpu.matmul %20, %22, %cst_22 {dimension_numbers = #tpu.dot_dimension_numbers<[1], [0], [0], [1], [0, 0, 1, 1], [], []>} : vector<80x16xf32>, vector<16x16xf32>, vector<80x16xf32> -> vector<80x16xf32>
    %24 = arith.addf %18, %23 : vector<80x16xf32>
    %c0_23 = arith.constant 0 : index
    %c1 = arith.constant 1 : index
    %c0_24 = arith.constant 0 : index
    %25 = vector.load %arg9[%c0_23, %c1, %c0_24] : memref<2x44x16xf32, #tpu.memory_space<vmem>>, vector<2x40x16xf32>
    %26 = vector.shape_cast %25 : vector<2x40x16xf32> to vector<80x16xf32>
    %c1_25 = arith.constant 1 : index
    %c0_26 = arith.constant 0 : index
    %c0_27 = arith.constant 0 : index
    %27 = vector.load %arg4[%c1_25, %c0_26, %c0_27] : memref<5x16x16xf32, #tpu.memory_space<vmem>>, vector<1x16x16xf32>
    %28 = vector.shape_cast %27 : vector<1x16x16xf32> to vector<16x16xf32>
    %cst_28 = arith.constant dense<0.000000e+00> : vector<80x16xf32>
    %29 = tpu.matmul %26, %28, %cst_28 {dimension_numbers = #tpu.dot_dimension_numbers<[1], [0], [0], [1], [0, 0, 1, 1], [], []>} : vector<80x16xf32>, vector<16x16xf32>, vector<80x16xf32> -> vector<80x16xf32>
    %30 = arith.addf %24, %29 : vector<80x16xf32>
    %c0_29 = arith.constant 0 : index
    %c2_30 = arith.constant 2 : index
    %c0_31 = arith.constant 0 : index
    %31 = vector.load %arg9[%c0_29, %c2_30, %c0_31] : memref<2x44x16xf32, #tpu.memory_space<vmem>>, vector<2x40x16xf32>
    %32 = vector.shape_cast %31 : vector<2x40x16xf32> to vector<80x16xf32>
    %c2_32 = arith.constant 2 : index
    %c0_33 = arith.constant 0 : index
    %c0_34 = arith.constant 0 : index
    %33 = vector.load %arg4[%c2_32, %c0_33, %c0_34] : memref<5x16x16xf32, #tpu.memory_space<vmem>>, vector<1x16x16xf32>
    %34 = vector.shape_cast %33 : vector<1x16x16xf32> to vector<16x16xf32>
    %cst_35 = arith.constant dense<0.000000e+00> : vector<80x16xf32>
    %35 = tpu.matmul %32, %34, %cst_35 {dimension_numbers = #tpu.dot_dimension_numbers<[1], [0], [0], [1], [0, 0, 1, 1], [], []>} : vector<80x16xf32>, vector<16x16xf32>, vector<80x16xf32> -> vector<80x16xf32>
    %36 = arith.addf %30, %35 : vector<80x16xf32>
    %c0_36 = arith.constant 0 : index
    %c3 = arith.constant 3 : index
    %c0_37 = arith.constant 0 : index
    %37 = vector.load %arg9[%c0_36, %c3, %c0_37] : memref<2x44x16xf32, #tpu.memory_space<vmem>>, vector<2x40x16xf32>
    %38 = vector.shape_cast %37 : vector<2x40x16xf32> to vector<80x16xf32>
    %c3_38 = arith.constant 3 : index
    %c0_39 = arith.constant 0 : index
    %c0_40 = arith.constant 0 : index
    %39 = vector.load %arg4[%c3_38, %c0_39, %c0_40] : memref<5x16x16xf32, #tpu.memory_space<vmem>>, vector<1x16x16xf32>
    %40 = vector.shape_cast %39 : vector<1x16x16xf32> to vector<16x16xf32>
    %cst_41 = arith.constant dense<0.000000e+00> : vector<80x16xf32>
    %41 = tpu.matmul %38, %40, %cst_41 {dimension_numbers = #tpu.dot_dimension_numbers<[1], [0], [0], [1], [0, 0, 1, 1], [], []>} : vector<80x16xf32>, vector<16x16xf32>, vector<80x16xf32> -> vector<80x16xf32>
    %42 = arith.addf %36, %41 : vector<80x16xf32>
    %c0_42 = arith.constant 0 : index
    %c4 = arith.constant 4 : index
    %c0_43 = arith.constant 0 : index
    %43 = vector.load %arg9[%c0_42, %c4, %c0_43] : memref<2x44x16xf32, #tpu.memory_space<vmem>>, vector<2x40x16xf32>
    %44 = vector.shape_cast %43 : vector<2x40x16xf32> to vector<80x16xf32>
    %c4_44 = arith.constant 4 : index
    %c0_45 = arith.constant 0 : index
    %c0_46 = arith.constant 0 : index
    %45 = vector.load %arg4[%c4_44, %c0_45, %c0_46] : memref<5x16x16xf32, #tpu.memory_space<vmem>>, vector<1x16x16xf32>
    %46 = vector.shape_cast %45 : vector<1x16x16xf32> to vector<16x16xf32>
    %cst_47 = arith.constant dense<0.000000e+00> : vector<80x16xf32>
    %47 = tpu.matmul %44, %46, %cst_47 {dimension_numbers = #tpu.dot_dimension_numbers<[1], [0], [0], [1], [0, 0, 1, 1], [], []>} : vector<80x16xf32>, vector<16x16xf32>, vector<80x16xf32> -> vector<80x16xf32>
    %48 = arith.addf %42, %47 : vector<80x16xf32>
    %c0_48 = arith.constant 0 : index
    %c0_49 = arith.constant 0 : index
    %49 = vector.load %arg5[%c0_48, %c0_49] : memref<1x16xf32, #tpu.memory_space<vmem>>, vector<1x16xf32>
    %50 = vector.shape_cast %49 : vector<1x16xf32> to vector<16xf32>
    %51 = vector.shape_cast %50 : vector<16xf32> to vector<1x16xf32>
    %52 = vector.broadcast %51 : vector<1x16xf32> to vector<80x16xf32>
    %53 = arith.addf %48, %52 : vector<80x16xf32>
    %54 = vector.shape_cast %53 : vector<80x16xf32> to vector<2x40x16xf32>
    %c0_50 = arith.constant 0 : index
    %c0_51 = arith.constant 0 : index
    %c0_52 = arith.constant 0 : index
    %55 = vector.load %arg6[%c0_50, %c0_51, %c0_52] : memref<2x40x16xf32, #tpu.memory_space<vmem>>, vector<2x40x16xf32>
    tpu.vector_store %arg6[%c0_50, %c0_51, %c0_52], %54 {strides = array<i32>} : memref<2x40x16xf32, #tpu.memory_space<vmem>>, vector<2x40x16xf32>,
    %cst_53 = arith.constant dense<0.000000e+00> : vector<16xf32>
    %56 = vector.multi_reduction <add>, %53, %cst_53 [0] : vector<80x16xf32> to vector<16xf32>
    %c0_54 = arith.constant 0 : index
    %c0_55 = arith.constant 0 : index
    %57 = vector.load %arg7[%c0_54, %c0_55] : memref<1x16xf32, #tpu.memory_space<vmem>>, vector<1x16xf32>
    %58 = vector.shape_cast %57 : vector<1x16xf32> to vector<16xf32>
    %59 = vector.shape_cast %56 : vector<16xf32> to vector<1x16xf32>
    tpu.vector_store %arg7[%c0_54, %c0_55], %59 {strides = array<i32>} : memref<1x16xf32, #tpu.memory_space<vmem>>, vector<1x16xf32>,
    %60 = arith.mulf %53, %53 : vector<80x16xf32>
    %cst_56 = arith.constant dense<0.000000e+00> : vector<16xf32>
    %61 = vector.multi_reduction <add>, %60, %cst_56 [0] : vector<80x16xf32> to vector<16xf32>
    %c0_57 = arith.constant 0 : index
    %c0_58 = arith.constant 0 : index
    %62 = vector.load %arg8[%c0_57, %c0_58] : memref<1x16xf32, #tpu.memory_space<vmem>>, vector<1x16xf32>
    %63 = vector.shape_cast %62 : vector<1x16xf32> to vector<16xf32>
    %64 = vector.shape_cast %61 : vector<16xf32> to vector<1x16xf32>
    tpu.vector_store %arg8[%c0_57, %c0_58], %64 {strides = array<i32>} : memref<1x16xf32, #tpu.memory_space<vmem>>, vector<1x16xf32>,
    return
  }
  func.func @transform_0(%arg0: i32) -> (i32, i32, i32) {
    %c0_i32 = arith.constant 0 : i32
    %c0_i32_0 = arith.constant 0 : i32
    %c0_i32_1 = arith.constant 0 : i32
    return %arg0, %c0_i32, %c0_i32_0 : i32, i32, i32
  }
  func.func @transform_1(%arg0: i32) -> (i32, i32) {
    %c0_i32 = arith.constant 0 : i32
    %c0_i32_0 = arith.constant 0 : i32
    %c0_i32_1 = arith.constant 0 : i32
    return %c0_i32, %c0_i32_0 : i32, i32
  }
  func.func @transform_2(%arg0: i32) -> (i32, i32) {
    %c0_i32 = arith.constant 0 : i32
    %c0_i32_0 = arith.constant 0 : i32
    %c0_i32_1 = arith.constant 0 : i32
    return %c0_i32, %c0_i32_0 : i32, i32
  }
  func.func @transform_3(%arg0: i32) -> (i32, i32, i32) {
    %c0_i32 = arith.constant 0 : i32
    %c0_i32_0 = arith.constant 0 : i32
    %c0_i32_1 = arith.constant 0 : i32
    %c0_i32_2 = arith.constant 0 : i32
    return %c0_i32, %c0_i32_0, %c0_i32_1 : i32, i32, i32
  }
  func.func @transform_4(%arg0: i32) -> (i32, i32) {
    %c0_i32 = arith.constant 0 : i32
    %c0_i32_0 = arith.constant 0 : i32
    %c0_i32_1 = arith.constant 0 : i32
    return %c0_i32, %c0_i32_0 : i32, i32
  }
  func.func @transform_5(%arg0: i32) -> (i32, i32, i32) {
    %c0_i32 = arith.constant 0 : i32
    %c0_i32_0 = arith.constant 0 : i32
    %c0_i32_1 = arith.constant 0 : i32
    return %arg0, %c0_i32, %c0_i32_0 : i32, i32, i32
  }
  func.func @transform_6(%arg0: i32) -> (i32, i32) {
    %c0_i32 = arith.constant 0 : i32
    %c0_i32_0 = arith.constant 0 : i32
    return %arg0, %c0_i32 : i32, i32
  }
  func.func @transform_7(%arg0: i32) -> (i32, i32) {
    %c0_i32 = arith.constant 0 : i32
    %c0_i32_0 = arith.constant 0 : i32
    return %arg0, %c0_i32 : i32, i32
  }
}

</mosaic_0001>

<bundles_post_ra>
// kernel: encoder_layer_forward.5
= control target key start
LH: loop header
LB: loop body
LE: loop exit
PB: predicated region body
PF: predicated region fallthrough
CT: control target
= control target key end

     0   :  { %s442_s0 = inlined_call_operand.vmem [shape: f32[8,10,16], index: 0, kind: input, shape index: {}]   ;;  %s443_s1 = inlined_call_operand.vmem [shape: f32[1,16], index: 1, kind: input, shape index: {}]   ;;  %s444_s2 = inlined_call_operand.vmem [shape: f32[1,16], index: 2, kind: input, shape index: {}]   ;;  %s445_s3 = inlined_call_operand.vmem [shape: f32[8,10,16], index: 3, kind: output, shape index: {0}]   ;;  %s446_s4 = inlined_call_operand.hbm [shape: f32[8,16], index: 4, kind: output, shape index: {1}]  }
   0x1   :  { %v17_v0 = vld [vmem:[%s442_s0] sm:$0xff]  ;;  %v18_v1 = vld [vmem:[%s442_s0 + $0x8] sm:$0x3]  ;;  %v19_v2 = vld [vmem:[%s442_s0 + $0x10] sm:$0xff] }
   0x2   :  { %v20_v3 = vld [vmem:[%s442_s0 + $0x18] sm:$0x3]  ;;  %v21_v4 = vld [vmem:[%s442_s0 + $0x20] sm:$0xff]  ;;  %v22_v5 = vld [vmem:[%s442_s0 + $0x28] sm:$0x3] }
   0x3   :  { %v23_v6 = vld [vmem:[%s442_s0 + $0x30] sm:$0xff]  ;;  %v24_v7 = vld [vmem:[%s442_s0 + $0x38] sm:$0x3]  ;;  %v25_v8 = vld [vmem:[%s442_s0 + $0x40] sm:$0xff] }
   0x4   :  { %v26_v9 = vld [vmem:[%s442_s0 + $0x48] sm:$0x3]  ;;  %v27_v10 = vld [vmem:[%s442_s0 + $0x50] sm:$0xff]  ;;  %v28_v11 = vld [vmem:[%s442_s0 + $0x58] sm:$0x3] }
   0x5   :  { %v29_v12 = vld [vmem:[%s442_s0 + $0x60] sm:$0xff]  ;;  %v30_v13 = vld [vmem:[%s442_s0 + $0x68] sm:$0x3]  ;;  %v31_v15 = vld [vmem:[%s442_s0 + $0x70] sm:$0xff] }
   0x6   :  { %v227_v14 = vld [vmem:[%s443_s1] ss:$0 sm:$0xff]  ;;  %v32_v16 = vld [vmem:[%s442_s0 + $0x78] sm:$0x3] }
   0x7   :  { %v40_v17 = vmul.f32 %v227_v14, %v17_v0  ;;  %v41_v18 = vmul.f32 %v227_v14, %v18_v1  ;;  %v42_v19 = vmul.f32 %v227_v14, %v19_v2  ;;  %v43_v20 = vmul.f32 %v227_v14, %v20_v3 }
   0x8   :  { %10 = vsyncpa [#allocation3], 0  ;;  %v44_v21 = vmul.f32 %v227_v14, %v21_v4  ;;  %v45_v22 = vmul.f32 %v227_v14, %v22_v5  ;;  %v46_v23 = vmul.f32 %v227_v14, %v23_v6  ;;  %v47_v24 = vmul.f32 %v227_v14, %v24_v7  ;;  %v228_v25 = vld [vmem:[%s444_s2] ss:$0 sm:$0xff] }
   0x9   :  { %vm95_vm0 = vcmask 130048   ;;  %vm97_vm1 = vcmask 123904   ;;  %v48_v26 = vmul.f32 %v227_v14, %v25_v8  ;;  %v49_v27 = vmul.f32 %v227_v14, %v26_v9 }
   0xa   :  { %v50_v28 = vmul.f32 %v227_v14, %v27_v10  ;;  %v51_v29 = vmul.f32 %v227_v14, %v28_v11  ;;  %v52_v30 = vmul.f32 %v227_v14, %v29_v12  ;;  %v53_v31 = vmul.f32 %v227_v14, %v30_v13 }
   0xb   :  { %v54_v32 = vmul.f32 %v227_v14, %v31_v15  ;;  %v55_v33 = vmul.f32 %v227_v14, %v32_v16  ;;  %v63_v34 = vadd.f32 %v228_v25, %v40_v17  ;;  %v64_v35 = vadd.f32 %v228_v25, %v41_v18 }
   0xc   :  { %v65_v36 = vadd.f32 %v228_v25, %v42_v19  ;;  %v66_v37 = vadd.f32 %v228_v25, %v43_v20  ;;  %v67_v38 = vadd.f32 %v228_v25, %v44_v21  ;;  %v68_v39 = vadd.f32 %v228_v25, %v45_v22 }
   0xd   :  { %v69_v40 = vadd.f32 %v228_v25, %v46_v23  ;;  %v70_v41 = vadd.f32 %v228_v25, %v47_v24  ;;  %v71_v42 = vadd.f32 %v228_v25, %v48_v26  ;;  %v72_v43 = vadd.f32 %v228_v25, %v49_v27 }
   0xe   :  { %v73_v44 = vadd.f32 %v228_v25, %v50_v28  ;;  %v74_v45 = vadd.f32 %v228_v25, %v51_v29  ;;  %v334_v46 = vadd.f32 %v228_v25, %v52_v30  ;;  %v336_v47 = vadd.f32 %v228_v25, %v53_v31 }
   0xf   :  { %v338_v48 = vadd.f32 %v228_v25, %v54_v32  ;;  %v340_v49 = vadd.f32 %v228_v25, %v55_v33  ;;  %v79_v50 = vmax.f32 %v63_v34, 0.0  ;;  %v80_v51 = vmax.f32 %v64_v35, 0.0 }
  0x10   :  { %v81_v52 = vmax.f32 %v65_v36, 0.0  ;;  %v82_v53 = vmax.f32 %v66_v37, 0.0  ;;  %v83_v54 = vmax.f32 %v67_v38, 0.0  ;;  %v84_v55 = vmax.f32 %v68_v39, 0.0 }
  0x11   :  { %v85_v56 = vmax.f32 %v69_v40, 0.0  ;;  %v86_v57 = vmax.f32 %v70_v41, 0.0  ;;  %v87_v58 = vmax.f32 %v71_v42, 0.0  ;;  %v88_v59 = vmax.f32 %v72_v43, 0.0  ;;  %96 = vst.msk [vmem:[%s445_s3] sm:$0xff] %vm95_vm0, %v79_v50 }
  0x12   :  { %v89_v60 = vmax.f32 %v73_v44, 0.0  ;;  %v90_v61 = vmax.f32 %v74_v45, 0.0  ;;  %98 = vst.msk [vmem:[%s445_s3 + $0x8] sm:$0x3] %vm97_vm1, %v80_v51  ;;  %100 = vst.msk [vmem:[%s445_s3 + $0x18] sm:$0x3] %vm97_vm1, %v82_v53 }
  0x13   :  { %99 = vst.msk [vmem:[%s445_s3 + $0x10] sm:$0xff] %vm95_vm0, %v81_v52  ;;  %v91_v62 = vmax.f32 %v334_v46, 0.0  ;;  %v92_v63 = vmax.f32 %v336_v47, 0.0  ;;  %v93_v0 = vmax.f32 %v338_v48, 0.0  ;;  %v94_v1 = vmax.f32 %v340_v49, 0.0  ;;  %101 = vst.msk [vmem:[%s445_s3 + $0x20] sm:$0xff] %vm95_vm0, %v83_v54 }
  0x14   :  { %102 = vst.msk [vmem:[%s445_s3 + $0x28] sm:$0x3] %vm97_vm1, %v84_v55  ;;  %104 = vst.msk [vmem:[%s445_s3 + $0x38] sm:$0x3] %vm97_vm1, %v86_v57  ;;  %v113_v2 = vsel %vm95_vm0, %v79_v50, -inf  ;;  %v114_v3 = vsel %vm97_vm1, %v80_v51, -inf }
  0x15   :  { %103 = vst.msk [vmem:[%s445_s3 + $0x30] sm:$0xff] %vm95_vm0, %v85_v56  ;;  %v122_v4 = vsel %vm95_vm0, %v81_v52, -inf  ;;  %v123_v5 = vsel %vm97_vm1, %v82_v53, -inf  ;;  %105 = vst.msk [vmem:[%s445_s3 + $0x40] sm:$0xff] %vm95_vm0, %v87_v58  ;;  %v115_v6 = vmax.f32 %v113_v2, %v114_v3  ;;  %v131_v8 = vsel %vm95_vm0, %v83_v54, -inf }
  0x16   :  { %106 = vst.msk [vmem:[%s445_s3 + $0x48] sm:$0x3] %vm97_vm1, %v88_v59  ;;  %108 = vst.msk [vmem:[%s445_s3 + $0x58] sm:$0x3] %vm97_vm1, %v90_v61  ;;  %v124_v7 = vmax.f32 %v122_v4, %v123_v5  ;;  %v132_v9 = vsel %vm97_vm1, %v84_v55, -inf  ;;  %v140_v11 = vsel %vm95_vm0, %v85_v56, -inf }
  0x17   :  { %107 = vst.msk [vmem:[%s445_s3 + $0x50] sm:$0xff] %vm95_vm0, %v89_v60  ;;  %109 = vst.msk [vmem:[%s445_s3 + $0x60] sm:$0xff] %vm95_vm0, %v91_v62  ;;  %v133_v10 = vmax.f32 %v131_v8, %v132_v9  ;;  %v141_v12 = vsel %vm97_vm1, %v86_v57, -inf  ;;  %v149_v13 = vsel %vm95_vm0, %v87_v58, -inf  ;;  %v116_v14 = vrot.slane %v115_v6, 4 }
  0x18   :  { %110 = vst.msk [vmem:[%s445_s3 + $0x68] sm:$0x3] %vm97_vm1, %v92_v63  ;;  %112 = vst.msk [vmem:[%s445_s3 + $0x78] sm:$0x3] %vm97_vm1, %v94_v1  ;;  %v125_v15 = vrot.slane %v124_v7, 4  ;;  %v142_v16 = vmax.f32 %v140_v11, %v141_v12  ;;  %v150_v17 = vsel %vm97_vm1, %v88_v59, -inf }
  0x19   :  { %111 = vst.msk [vmem:[%s445_s3 + $0x70] sm:$0xff] %vm95_vm0, %v93_v0  ;;  %v134_v18 = vrot.slane %v133_v10, 4  ;;  %v151_v19 = vmax.f32 %v149_v13, %v150_v17  ;;  %v158_v20 = vsel %vm95_vm0, %v89_v60, -inf  ;;  %v159_v21 = vsel %vm97_vm1, %v90_v61, -inf  ;;  %s254_s3 = smov [#allocation2]  }
  0x1a   :  { %vm193_vm2 = vcmask 1041409   ;;  %v117_v22 = vmax.f32 %v115_v6, %v116_v14  ;;  %v126_v23 = vmax.f32 %v124_v7, %v125_v15  ;;  %v143_v24 = vrot.slane %v142_v16, 4  ;;  %s217_s25 = sshll.u32 %s254_s3, 4  ;;  %s218_s25 = int_to_ptr.vmem [resolvable:$true] %s217_s25 }
  0x1b   :  { %v160_v25 = vmax.f32 %v158_v20, %v159_v21  ;;  %vm195_vm3 = vcmask 1042434   ;;  %v135_v26 = vmax.f32 %v133_v10, %v134_v18  ;;  %v152_v27 = vrot.slane %v151_v19, 4  ;;  %s230_s26 = scalar_lea.vmem %s218_s25, 128  ;;  %p235_p1 = scmp.lt.s32.totalorder %s218_s25, %s218_s25 }
  0x1c   :  { %v167_v28 = vsel %vm95_vm0, %v91_v62, -inf  ;;  %v168_v29 = vsel %vm97_vm1, %v92_v63, -inf  ;;  %vm197_vm4 = vcmask 1043459   ;;  %v118_v30 = vrot.slane %v117_v22, 2  ;;  %p231_p0 = scmp.ne.s32.totalorder %s218_s25, %s230_s26  ;;  %p236_p2 = scmp.lt.s32.totalorder %s230_s26, %s230_s26 }
  0x1d   :  { %v127_v31 = vrot.slane %v126_v23, 2  ;;  %v144_v32 = vmax.f32 %v142_v16, %v143_v24  ;;  %v161_v33 = vrot.slane %v160_v25, 4  ;;  %v136_v34 = vrot.slane %v135_v26, 2 }
  0x1e   :  { %v153_v35 = vmax.f32 %v151_v19, %v152_v27  ;;  %v169_v36 = vmax.f32 %v167_v28, %v168_v29  ;;  %v176_v37 = vsel %vm95_vm0, %v93_v0, -inf  ;;  %v119_v38 = vmax.f32 %v117_v22, %v118_v30  ;;  %p237_p3 = por %p236_p2, %p235_p1 }
  0x1f   :  { %v128_v39 = vmax.f32 %v126_v23, %v127_v31  ;;  %v145_v40 = vrot.slane %v144_v32, 2  ;;  %v162_v41 = vmax.f32 %v160_v25, %v161_v33  ;;  %v137_v42 = vmax.f32 %v135_v26, %v136_v34 }
  0x20   :  { %v154_v43 = vrot.slane %v153_v35, 2  ;;  %v170_v44 = vrot.slane %v169_v36, 4  ;;  %v177_v45 = vsel %vm97_vm1, %v94_v1, -inf  ;;  %v120_v46 = vrot.slane %v119_v38, 1  ;;  %p238_p4 = pnand %p237_p3, %p231_p0 }
  0x21   :  { %v129_v47 = vrot.slane %v128_v39, 1  ;;  %v146_v48 = vmax.f32 %v144_v32, %v145_v40  ;;  %v163_v49 = vrot.slane %v162_v41, 2  ;;  %v138_v50 = vrot.slane %v137_v42, 1 }
  0x22   :  { %v155_v51 = vmax.f32 %v153_v35, %v154_v43  ;;  %v171_v52 = vmax.f32 %v169_v36, %v170_v44  ;;  %v178_v53 = vmax.f32 %v176_v37, %v177_v45  ;;  %v121_v54 = vmax.f32 %v119_v38, %v120_v46 }
  0x23   :  { %v130_v55 = vmax.f32 %v128_v39, %v129_v47  ;;  %v147_v56 = vrot.slane %v146_v48, 1  ;;  %v164_v57 = vmax.f32 %v162_v41, %v163_v49  ;;  %v139_v58 = vmax.f32 %v137_v42, %v138_v50 }
  0x24   :  { %v156_v59 = vrot.slane %v155_v51, 1  ;;  %v172_v60 = vrot.slane %v171_v52, 2  ;;  %v179_v61 = vrot.slane %v178_v53, 4  ;;  %vm199_vm5 = vcmask 1044484  }
  0x25   :  { %v148_v62 = vmax.f32 %v146_v48, %v147_v56  ;;  %v165_v63 = vrot.slane %v164_v57, 1  ;;  %v194_v0 = vsel %vm193_vm2, %v130_v55, %v121_v54  ;;  %vm201_vm6 = vcmask 1045509  }
  0x26   :  { %v157_v1 = vmax.f32 %v155_v51, %v156_v59  ;;  %v173_v2 = vmax.f32 %v171_v52, %v172_v60  ;;  %v180_v3 = vmax.f32 %v178_v53, %v179_v61  ;;  %v196_v4 = vsel %vm195_vm3, %v139_v58, %v194_v0 }
  0x27   :  { %v166_v5 = vmax.f32 %v164_v57, %v165_v63  ;;  %v198_v6 = vsel %vm197_vm4, %v148_v62, %v196_v4  ;;  %vm203_vm7 = vcmask 1046534   ;;  %vm205_vm8 = vcmask 1047559  }
  0x28   :  { %v174_v7 = vrot.slane %v173_v2, 1  ;;  %v181_v8 = vrot.slane %v180_v3, 2  ;;  %v200_v9 = vsel %vm199_vm5, %v157_v1, %v198_v6 }
  0x29   :  { %v202_v12 = vsel %vm201_vm6, %v166_v5, %v200_v9 }
  0x2a   :  { %v175_v10 = vmax.f32 %v173_v2, %v174_v7  ;;  %v182_v11 = vmax.f32 %v180_v3, %v181_v8 }
  0x2c   :  { %v183_v13 = vrot.slane %v182_v11, 1  ;;  %v204_v14 = vsel %vm203_vm7, %v175_v10, %v202_v12 }
  0x2e   :  { %v184_v15 = vmax.f32 %v182_v11, %v183_v13 }
  0x30   :  { %v206_v16 = vsel %vm205_vm8, %v184_v15, %v204_v14 }
  0x31   :  { %208 = vst.msk [vmem:[#allocation2] sm:$0xff] %vm95_vm0, %v206_v16 }
  0x32   :  { %241 = shalt.err (!%p238_p4)
}
  0x33   :  { %s242_s29 = scalar_lea.hbm %s446_s4, 128 }
  0x34   :  { %p243_p5 = scmp.ne.s32.totalorder %s446_s4, %s242_s29  ;;  %p246_p6 = scmp.lt.u32.totalorder %s242_s29, %s446_s4 }
  0x36   :  { %p248_p7 = pnand %p246_p6, %p243_p5 }
  0x38   :  { %251 = shalt.err (!%p248_p7)
}
  0x39   :  { %220 = dma.vmem_to_hbm [thread:$0]  %s218_s25, 128, %s446_s4, [#allocation3]  }
  0x3a   :  { %252 = dma.done.wait [#allocation3], 128  }
  0x3b   :  { %253 = vsyncadd [#allocation3], 4294967168 }
  0x3c   :  { %226 = vsyncpa [#allocation3], 1 }

// kernel: encoder_layer_forward.3
= control target key start
LH: loop header
LB: loop body
LE: loop exit
PB: predicated region body
PF: predicated region fallthrough
CT: control target
= control target key end

     0   :  { %vm33_vm0 = vcmask 58368   ;;  %vm38_vm1 = vcmask 64512   ;;  %v1204_v3 = vmov 0.0   ;;  %vm880_vm2 = vcmask 130048   ;;  %s1437_s3 = inlined_call_operand.vmem [shape: f32[5,8,16], index: 3, kind: input, shape index: {}]   ;;  %s1438_s1 = inlined_call_operand.vmem [shape: f32[1,8], index: 1, kind: input, shape index: {}]   ;;  %s1439_s2 = inlined_call_operand.vmem [shape: f32[1,8], index: 2, kind: input, shape index: {}]   ;;  %s1440_s0 = inlined_call_operand.vmem [shape: f32[2,40,8], index: 0, kind: input, shape index: {}]   ;;  %s1441_s4 = inlined_call_operand.vmem [shape: f32[1,16], index: 4, kind: input, shape index: {}]   ;;  %s1442_s5 = inlined_call_operand.vmem [shape: f32[2,40,16], index: 5, kind: output, shape index: {0}]   ;;  %s1443_s6 = inlined_call_operand.vmem [shape: f32[1,16], index: 6, kind: output, shape index: {1}]   ;;  %s1444_s7 = inlined_call_operand.vmem [shape: f32[1,16], index: 7, kind: output, shape index: {2}]  }
   0x1   :  { %v1248_v0 = vld [vmem:[%s1437_s3 + $0x10] sm:$0xff]  ;;  %v966_v1 = vld [vmem:[%s1437_s3 + $0x8] sm:$0xff]  ;;  %v23_v2 = vld [vmem:[%s1440_s0] sm:$0xff]  ;;  %34 = vst.msk [vmem:[#allocation2] sm:$0x3] %vm33_vm0, %v1204_v3  ;;  %vm916_vm3 = vcmask 122880  }
   0x2   :  { %35 = vst.msk [vmem:[#allocation2 + $0x30] sm:$0x3] %vm33_vm0, %v1204_v3  ;;  %36 = vst.msk [vmem:[#allocation2 + $0x2a] sm:$0x3] %vm33_vm0, %v1204_v3  ;;  %1110 = vmatprep.subr.mxu0 %v1248_v0  ;;  %1076 = vmatprep.subr.mxu1 %v966_v1  ;;  %v998_v4 = vld [vmem:[%s1437_s3 + $0x18] sm:$0xff]  ;;  %v24_v5 = vld [vmem:[%s1440_s0 + $0x8] sm:$0xff] }
   0x3   :  { %37 = vst.msk [vmem:[#allocation2 + $0x5a] sm:$0x3] %vm33_vm0, %v1204_v3  ;;  %v25_v6 = vld [vmem:[%s1440_s0 + $0x10] sm:$0xff]  ;;  %1111 = vmatpush3.msra.mxu0 %v1248_v0  ;;  %1077 = vmatpush3.msra.mxu1 %v966_v1  ;;  %v59_v7 = vld [vmem:[%s1437_s3] sm:$0xff]  ;;  %v26_v8 = vld [vmem:[%s1440_s0 + $0x18] sm:$0xff] }
   0x4   :  { %39 = vst.msk [vmem:[#allocation2 + $0x2] sm:$0xff] %vm38_vm1, %v23_v2  ;;  %40 = vst.msk [vmem:[#allocation2 + $0xa] sm:$0xff] %vm38_vm1, %v24_v5  ;;  %v27_v9 = vld [vmem:[%s1440_s0 + $0x20] sm:$0xff]  ;;  %1127 = vmatprep.subr.mxu0 %v998_v4  ;;  %1093 = vmatprep.subr.mxu1 %v59_v7  ;;  %v28_v10 = vld [vmem:[%s1440_s0 + $0x28] sm:$0xff] }
   0x5   :  { %41 = vst.msk [vmem:[#allocation2 + $0x12] sm:$0xff] %vm38_vm1, %v25_v6  ;;  %42 = vst.msk [vmem:[#allocation2 + $0x1a] sm:$0xff] %vm38_vm1, %v26_v8  ;;  %v29_v11 = vld [vmem:[%s1440_s0 + $0x30] sm:$0xff]  ;;  %v30_v12 = vld [vmem:[%s1440_s0 + $0x38] sm:$0xff] }
   0x6   :  { %43 = vst.msk [vmem:[#allocation2 + $0x22] sm:$0xff] %vm38_vm1, %v27_v9  ;;  %44 = vst.msk [vmem:[#allocation2 + $0x32] sm:$0xff] %vm38_vm1, %v28_v10  ;;  %v31_v13 = vld [vmem:[%s1440_s0 + $0x40] sm:$0xff]  ;;  %v32_v14 = vld [vmem:[%s1440_s0 + $0x48] sm:$0xff] }
   0x7   :  { %45 = vst.msk [vmem:[#allocation2 + $0x3a] sm:$0xff] %vm38_vm1, %v29_v11  ;;  %46 = vst.msk [vmem:[#allocation2 + $0x42] sm:$0xff] %vm38_vm1, %v30_v12  ;;  %v1009_v21 = vld [vmem:[%s1437_s3 + $0x20] sm:$0xff] }
   0x8   :  { %47 = vst.msk [vmem:[#allocation2 + $0x4a] sm:$0xff] %vm38_vm1, %v31_v13  ;;  %48 = vst.msk [vmem:[#allocation2 + $0x52] sm:$0xff] %vm38_vm1, %v32_v14  ;;  %v1359_v9 = vld [vmem:[%s1441_s4] ss:$0 sm:$0xff] }
   0xb   :  { %v60_v15 = vld [vmem:[#allocation2 + $0x1] sm:$0xff]  ;;  %v61_v17 = vld [vmem:[#allocation2 + $0x9] sm:$0xff] }
   0xc   :  { %v362_v16 = vld [vmem:[#allocation2 + $0x2] sm:$0xff]  ;;  %1078 = vmatprep.mubr.msk.f32.mxu1 %vm38_vm1, %v60_v15  ;;  %v363_v18 = vld [vmem:[#allocation2 + $0xa] sm:$0xff]  ;;  %v364_v20 = vld [vmem:[#allocation2 + $0x12] sm:$0xff] }
   0xd   :  { %1112 = vmatprep.mubr.msk.f32.mxu0 %vm38_vm1, %v362_v16  ;;  %v62_v19 = vld [vmem:[#allocation2 + $0x11] sm:$0xff]  ;;  %1079 = vmatmul.mubr.msk.f32.vlgmr.msra.gmra.mrb[0].mxu1 %vm38_vm1, %v61_v17  ;;  %v63_v22 = vld [vmem:[#allocation2 + $0x19] sm:$0xff]  ;;  %v64_v24 = vld [vmem:[#allocation2 + $0x21] sm:$0xff] }
   0xe   :  { %1113 = vmatmul.mubr.msk.f32.vlgmr.msra.gmra.mrb[0].mxu0 %vm38_vm1, %v363_v18  ;;  %1081 = vmatprep.mubr.msk.f32.mxu1 %vm38_vm1, %v62_v19  ;;  %v365_v23 = vld [vmem:[#allocation2 + $0x1a] sm:$0xff]  ;;  %v366_v25 = vld [vmem:[#allocation2 + $0x22] sm:$0xff]  ;;  %v65_v26 = vld [vmem:[#allocation2 + $0x31] sm:$0xff] }
   0xf   :  { %1128 = vmatpush3.msra.mxu0 %v998_v4  ;;  %1115 = vmatprep.mubr.msk.f32.mxu0 %vm38_vm1, %v364_v20  ;;  %v367_v27 = vld [vmem:[#allocation2 + $0x32] sm:$0xff]  ;;  %v529_v29 = vld [vmem:[#allocation2 + $0x3] sm:$0xff]  ;;  %v532_v35 = vld [vmem:[#allocation2 + $0x1b] sm:$0xff] }
  0x10   :  { %1094 = vmatpush3.msra.mxu1 %v59_v7  ;;  %1144 = vmatprep.subr.mxu0 %v1009_v21  ;;  %v66_v28 = vld [vmem:[#allocation2 + $0x39] sm:$0xff]  ;;  %v67_v30 = vld [vmem:[#allocation2 + $0x41] sm:$0xff]  ;;  %v530_v31 = vld [vmem:[#allocation2 + $0xb] sm:$0xff] }
  0x11   :  { %1161 = vmatprep.subr.mxu1 %v1248_v0  ;;  %1082 = vmatmul.mubr.msk.f32.gmra.mrb[2].mxu1 %vm38_vm1, %v63_v22  ;;  %v68_v32 = vld [vmem:[#allocation2 + $0x49] sm:$0xff]  ;;  %v531_v33 = vld [vmem:[#allocation2 + $0x13] sm:$0xff]  ;;  %v49_v36 = vld [vmem:[#allocation2] sm:$0xff] }
  0x12   :  { %1116 = vmatmul.mubr.msk.f32.gmra.mrb[2].mxu0 %vm38_vm1, %v365_v23  ;;  %1084 = vmatprep.mubr.msk.f32.mxu1 %vm38_vm1, %v64_v24  ;;  %v69_v34 = vld [vmem:[#allocation2 + $0x51] sm:$0xff]  ;;  %v533_v37 = vld [vmem:[#allocation2 + $0x23] sm:$0xff]  ;;  %v535_v41 = vld [vmem:[#allocation2 + $0x3b] sm:$0xff] }
  0x13   :  { %1118 = vmatprep.mubr.msk.f32.mxu0 %vm38_vm1, %v366_v25  ;;  %v50_v38 = vld [vmem:[#allocation2 + $0x8] sm:$0xff]  ;;  %v534_v39 = vld [vmem:[#allocation2 + $0x33] sm:$0xff]  ;;  %v53_v44 = vld [vmem:[#allocation2 + $0x20] sm:$0xff] }
  0x14   :  { %v51_v40 = vld [vmem:[#allocation2 + $0x10] sm:$0xff]  ;;  %v52_v42 = vld [vmem:[#allocation2 + $0x18] sm:$0xff]  ;;  %v536_v43 = vld [vmem:[#allocation2 + $0x43] sm:$0xff] }
  0x15   :  { %1085 = vmatmul.mubr.msk.f32.gmra.mrb[4].mxu1 %vm38_vm1, %v65_v26  ;;  %v537_v45 = vld [vmem:[#allocation2 + $0x4b] sm:$0xff]  ;;  %v538_v47 = vld [vmem:[#allocation2 + $0x53] sm:$0xff]  ;;  %v56_v50 = vld [vmem:[#allocation2 + $0x40] sm:$0xff] }
  0x16   :  { %1119 = vmatmul.mubr.msk.f32.gmra.mrb[4].mxu0 %vm38_vm1, %v367_v27  ;;  %1087 = vmatprep.mubr.msk.f32.mxu1 %vm38_vm1, %v66_v28  ;;  %v54_v46 = vld [vmem:[#allocation2 + $0x30] sm:$0xff]  ;;  %v55_v48 = vld [vmem:[#allocation2 + $0x38] sm:$0xff]  ;;  %v696_v49 = vld [vmem:[#allocation2 + $0x4] sm:$0xff] }
  0x17   :  { %1129 = vmatprep.mubr.msk.f32.mxu0 %vm38_vm1, %v529_v29  ;;  %v697_v51 = vld [vmem:[#allocation2 + $0xc] sm:$0xff]  ;;  %v698_v53 = vld [vmem:[#allocation2 + $0x14] sm:$0xff]  ;;  %v699_v55 = vld [vmem:[#allocation2 + $0x1c] sm:$0xff] }
  0x18   :  { %v57_v52 = vld [vmem:[#allocation2 + $0x48] sm:$0xff]  ;;  %v58_v54 = vld [vmem:[#allocation2 + $0x50] sm:$0xff]  ;;  %v368_v56 = vld [vmem:[#allocation2 + $0x3a] sm:$0xff] }
  0x19   :  { %1088 = vmatmul.mubr.msk.f32.gmra.mrb[6].mxu1 %vm38_vm1, %v67_v30  ;;  %v700_v57 = vld [vmem:[#allocation2 + $0x24] sm:$0xff]  ;;  %v701_v59 = vld [vmem:[#allocation2 + $0x34] sm:$0xff]  ;;  %v702_v61 = vld [vmem:[#allocation2 + $0x3c] sm:$0xff] }
  0x1a   :  { %1130 = vmatmul.mubr.msk.f32.vlgmr.msra.gmra.mrb[0].mxu0 %vm38_vm1, %v530_v31  ;;  %1090 = vmatprep.mubr.msk.f32.mxu1 %vm38_vm1, %v68_v32  ;;  %v369_v58 = vld [vmem:[#allocation2 + $0x42] sm:$0xff]  ;;  %v370_v60 = vld [vmem:[#allocation2 + $0x4a] sm:$0xff]  ;;  %v371_v62 = vld [vmem:[#allocation2 + $0x52] sm:$0xff] }
  0x1b   :  { %1145 = vmatpush3.msra.mxu0 %v1009_v21  ;;  %1132 = vmatprep.mubr.msk.f32.mxu0 %vm38_vm1, %v531_v33  ;;  %v703_v63 = vld [vmem:[#allocation2 + $0x44] sm:$0xff]  ;;  %v705_v1 = vld [vmem:[#allocation2 + $0x54] sm:$0xff] }
  0x1d   :  { %1091 = vmatmul.mubr.msk.f32.gmra.mrb[8].mxu1 %vm38_vm1, %v69_v34 }
  0x1e   :  { %1133 = vmatmul.mubr.msk.f32.gmra.mrb[2].mxu0 %vm38_vm1, %v532_v35  ;;  %1095 = vmatprep.mubr.msk.f32.mxu1 %vm38_vm1, %v49_v36 }
  0x1f   :  { %1135 = vmatprep.mubr.msk.f32.mxu0 %vm38_vm1, %v533_v37 }
  0x21   :  { %1096 = vmatmul.mubr.msk.f32.vlgmr.msra.gmra.mrb[0].mxu1 %vm38_vm1, %v50_v38 }
  0x22   :  { %1136 = vmatmul.mubr.msk.f32.gmra.mrb[4].mxu0 %vm38_vm1, %v534_v39  ;;  %1098 = vmatprep.mubr.msk.f32.mxu1 %vm38_vm1, %v51_v40 }
  0x23   :  { %1138 = vmatprep.mubr.msk.f32.mxu0 %vm38_vm1, %v535_v41  ;;  %1162 = vmatpush3.msra.mxu1 %v1248_v0  ;;  %v704_v0 = vld [vmem:[#allocation2 + $0x4c] sm:$0xff] }
  0x25   :  { %1099 = vmatmul.mubr.msk.f32.gmra.mrb[2].mxu1 %vm38_vm1, %v52_v42 }
  0x26   :  { %1139 = vmatmul.mubr.msk.f32.gmra.mrb[6].mxu0 %vm38_vm1, %v536_v43  ;;  %1101 = vmatprep.mubr.msk.f32.mxu1 %vm38_vm1, %v53_v44 }
  0x27   :  { %1141 = vmatprep.mubr.msk.f32.mxu0 %vm38_vm1, %v537_v45 }
  0x29   :  { %1102 = vmatmul.mubr.msk.f32.gmra.mrb[4].mxu1 %vm38_vm1, %v54_v46 }
  0x2a   :  { %1142 = vmatmul.mubr.msk.f32.gmra.mrb[8].mxu0 %vm38_vm1, %v538_v47  ;;  %1104 = vmatprep.mubr.msk.f32.mxu1 %vm38_vm1, %v55_v48 }
  0x2b   :  { %1146 = vmatprep.mubr.msk.f32.mxu0 %vm38_vm1, %v696_v49 }
  0x2d   :  { %1105 = vmatmul.mubr.msk.f32.gmra.mrb[6].mxu1 %vm38_vm1, %v56_v50 }
  0x2e   :  { %1147 = vmatmul.mubr.msk.f32.vlgmr.msra.gmra.mrb[0].mxu0 %vm38_vm1, %v697_v51  ;;  %1107 = vmatprep.mubr.msk.f32.mxu1 %vm38_vm1, %v57_v52 }
  0x2f   :  { %1149 = vmatprep.mubr.msk.f32.mxu0 %vm38_vm1, %v698_v53 }
  0x31   :  { %1108 = vmatmul.mubr.msk.f32.gmra.mrb[8].mxu1 %vm38_vm1, %v58_v54 }
  0x32   :  { %1150 = vmatmul.mubr.msk.f32.gmra.mrb[2].mxu0 %vm38_vm1, %v699_v55  ;;  %1121 = vmatprep.mubr.msk.f32.mxu1 %vm38_vm1, %v368_v56 }
  0x33   :  { %1152 = vmatprep.mubr.msk.f32.mxu0 %vm38_vm1, %v700_v57 }
  0x35   :  { %1122 = vmatmul.mubr.msk.f32.vlgmr.msra.gmra.mrb[6].mxu1 %vm38_vm1, %v369_v58 }
  0x36   :  { %1153 = vmatmul.mubr.msk.f32.gmra.mrb[4].mxu0 %vm38_vm1, %v701_v59  ;;  %1124 = vmatprep.mubr.msk.f32.mxu1 %vm38_vm1, %v370_v60 }
  0x37   :  { %1155 = vmatprep.mubr.msk.f32.mxu0 %vm38_vm1, %v702_v61 }
  0x39   :  { %1125 = vmatmul.mubr.msk.f32.gmra.mrb[8].mxu1 %vm38_vm1, %v371_v62 }
  0x3a   :  { %1156 = vmatmul.mubr.msk.f32.gmra.mrb[6].mxu0 %vm38_vm1, %v703_v63 }
  0x3b   :  { %1158 = vmatprep.mubr.msk.f32.mxu0 %vm38_vm1, %v704_v0 }
  0x3e   :  { %1159 = vmatmul.mubr.msk.f32.gmra.mrb[8].mxu0 %vm38_vm1, %v705_v1 }
  0xf4   :  { %v1097_v2 = vpop.f32.mrb[0].mxu1 }
  0xf5   :  { %v313_v3 = vpop.f32.mrb[1].mxu1 }
  0xf8   :  { %v1100_v4 = vpop.f32.mrb[2].mxu1 }
  0xf9   :  { %v323_v5 = vpop.f32.mrb[3].mxu1 }
  0xfc   :  { %v1103_v6 = vpop.f32.mrb[4].mxu1 }
  0xfd   :  { %v333_v7 = vpop.f32.mrb[5].mxu1 }
 0x101   :  { %v1148_v8 = vpop.f32.mrb[0].mxu0 }
 0x102   :  { %v1163_v10 = vadd.f32 %v1148_v8, %v1097_v2  ;;  %v804_v11 = vpop.f32.mrb[1].mxu0 }
 0x103   :  { %v1164_v12 = vadd.f32 %v804_v11, %v313_v3 }
 0x104   :  { %v871_v13 = vadd.f32 %v1163_v10, %v1359_v9 }
 0x105   :  { %v870_v14 = vadd.f32 %v1164_v12, %v1359_v9  ;;  %v1151_v15 = vpop.f32.mrb[2].mxu0 }
 0x106   :  { %882 = vst.msk [vmem:[%s1442_s5 + $0x8] sm:$0xff] %vm880_vm2, %v871_v13  ;;  %v892_v16 = vsel %vm880_vm2, %v871_v13, 0.0  ;;  %v919_v17 = vmul.f32 %v871_v13, %v871_v13  ;;  %v1165_v18 = vadd.f32 %v1151_v15, %v1100_v4  ;;  %v814_v19 = vpop.f32.mrb[3].mxu0 }
 0x107   :  { %881 = vst.msk [vmem:[%s1442_s5] sm:$0xff] %vm880_vm2, %v870_v14  ;;  %v891_v20 = vsel %vm880_vm2, %v870_v14, 0.0  ;;  %v918_v21 = vmul.f32 %v870_v14, %v870_v14  ;;  %v1166_v22 = vadd.f32 %v814_v19, %v323_v5 }
 0x108   :  { %v929_v23 = vsel %vm880_vm2, %v919_v17, 0.0  ;;  %v893_v24 = vadd.f32 %v892_v16, %v891_v20  ;;  %v873_v25 = vadd.f32 %v1165_v18, %v1359_v9  ;;  %v1123_v28 = vpop.f32.mrb[6].mxu1 }
 0x109   :  { %v928_v26 = vsel %vm880_vm2, %v918_v21, 0.0  ;;  %v872_v27 = vadd.f32 %v1166_v22, %v1359_v9  ;;  %v1154_v29 = vpop.f32.mrb[4].mxu0  ;;  %v500_v33 = vpop.f32.mrb[7].mxu1 }
 0x10a   :  { %v930_v30 = vadd.f32 %v929_v23, %v928_v26  ;;  %884 = vst.msk [vmem:[%s1442_s5 + $0x18] sm:$0xff] %vm880_vm2, %v873_v25  ;;  %v921_v31 = vmul.f32 %v873_v25, %v873_v25  ;;  %v1167_v32 = vadd.f32 %v1154_v29, %v1103_v6  ;;  %v824_v34 = vpop.f32.mrb[5].mxu0  ;;  %v896_v40 = vsel %vm880_vm2, %v873_v25, 0.0 }
 0x10b   :  { %883 = vst.msk [vmem:[%s1442_s5 + $0x10] sm:$0xff] %vm880_vm2, %v872_v27  ;;  %v894_v35 = vsel %vm880_vm2, %v872_v27, 0.0  ;;  %v920_v36 = vmul.f32 %v872_v27, %v872_v27  ;;  %v1168_v37 = vadd.f32 %v824_v34, %v333_v7 }
 0x10c   :  { %v895_v38 = vadd.f32 %v894_v35, %v893_v24  ;;  %v875_v39 = vadd.f32 %v1167_v32, %v1359_v9  ;;  %v1126_v43 = vpop.f32.mrb[8].mxu1  ;;  %v933_v45 = vsel %vm880_vm2, %v921_v31, 0.0 }
 0x10d   :  { %v931_v41 = vsel %vm880_vm2, %v920_v36, 0.0  ;;  %v874_v42 = vadd.f32 %v1168_v37, %v1359_v9  ;;  %v1157_v44 = vpop.f32.mrb[6].mxu0  ;;  %v510_v49 = vpop.f32.mrb[9].mxu1 }
 0x10e   :  { %v932_v46 = vadd.f32 %v931_v41, %v930_v30  ;;  %886 = vst.msk [vmem:[%s1442_s5 + $0x28] sm:$0xff] %vm880_vm2, %v875_v39  ;;  %v923_v47 = vmul.f32 %v875_v39, %v875_v39  ;;  %v897_v48 = vadd.f32 %v896_v40, %v895_v38  ;;  %v834_v50 = vpop.f32.mrb[7].mxu0  ;;  %v1169_v53 = vadd.f32 %v1157_v44, %v1123_v28 }
 0x10f   :  { %885 = vst.msk [vmem:[%s1442_s5 + $0x20] sm:$0xff] %vm880_vm2, %v874_v42  ;;  %v898_v51 = vsel %vm880_vm2, %v874_v42, 0.0  ;;  %v922_v52 = vmul.f32 %v874_v42, %v874_v42  ;;  %v1170_v54 = vadd.f32 %v834_v50, %v500_v33  ;;  %v900_v57 = vsel %vm880_vm2, %v875_v39, 0.0 }
 0x110   :  { %v899_v55 = vadd.f32 %v898_v51, %v897_v48  ;;  %v934_v56 = vadd.f32 %v933_v45, %v932_v46  ;;  %v877_v59 = vadd.f32 %v1169_v53, %v1359_v9  ;;  %v937_v2 = vsel %vm880_vm2, %v923_v47, 0.0 }
 0x111   :  { %v935_v58 = vsel %vm880_vm2, %v922_v52, 0.0  ;;  %v876_v60 = vadd.f32 %v1170_v54, %v1359_v9  ;;  %v1160_v61 = vpop.f32.mrb[8].mxu0 }
 0x112   :  { %v936_v62 = vadd.f32 %v935_v58, %v934_v56  ;;  %v901_v63 = vadd.f32 %v900_v57, %v899_v55  ;;  %v1171_v0 = vadd.f32 %v1160_v61, %v1126_v43  ;;  %v844_v1 = vpop.f32.mrb[9].mxu0  ;;  %888 = vst.msk [vmem:[%s1442_s5 + $0x38] sm:$0xff] %vm880_vm2, %v877_v59  ;;  %v925_v3 = vmul.f32 %v877_v59, %v877_v59 }
 0x113   :  { %887 = vst.msk [vmem:[%s1442_s5 + $0x30] sm:$0xff] %vm880_vm2, %v876_v60  ;;  %v902_v4 = vsel %vm880_vm2, %v876_v60, 0.0  ;;  %v924_v5 = vmul.f32 %v876_v60, %v876_v60  ;;  %v1172_v10 = vadd.f32 %v844_v1, %v510_v49  ;;  %v904_v12 = vsel %vm880_vm2, %v877_v59, 0.0 }
 0x114   :  { %v903_v6 = vadd.f32 %v902_v4, %v901_v63  ;;  %v938_v7 = vadd.f32 %v937_v2, %v936_v62  ;;  %v879_v8 = vadd.f32 %v1171_v0, %v1359_v9  ;;  %v941_v15 = vsel %vm880_vm2, %v925_v3, 0.0 }
 0x115   :  { %v939_v11 = vsel %vm880_vm2, %v924_v5, 0.0  ;;  %v878_v14 = vadd.f32 %v1172_v10, %v1359_v9 }
 0x116   :  { %v940_v13 = vadd.f32 %v939_v11, %v938_v7  ;;  %890 = vst.msk [vmem:[%s1442_s5 + $0x48] sm:$0xff] %vm880_vm2, %v879_v8  ;;  %v905_v16 = vadd.f32 %v904_v12, %v903_v6  ;;  %v927_v17 = vmul.f32 %v879_v8, %v879_v8  ;;  %v908_v22 = vsel %vm880_vm2, %v879_v8, 0.0 }
 0x117   :  { %889 = vst.msk [vmem:[%s1442_s5 + $0x40] sm:$0xff] %vm880_vm2, %v878_v14  ;;  %v906_v18 = vsel %vm880_vm2, %v878_v14, 0.0  ;;  %v926_v19 = vmul.f32 %v878_v14, %v878_v14 }
 0x118   :  { %v942_v20 = vadd.f32 %v941_v15, %v940_v13  ;;  %v907_v21 = vadd.f32 %v906_v18, %v905_v16  ;;  %v945_v25 = vsel %vm880_vm2, %v927_v17, 0.0 }
 0x119   :  { %v943_v23 = vsel %vm880_vm2, %v926_v19, 0.0 }
 0x11a   :  { %v909_v24 = vadd.f32 %v908_v22, %v907_v21  ;;  %v944_v9 = vadd.f32 %v943_v23, %v942_v20 }
 0x11c   :  { %v910_v26 = vrot.slane %v909_v24, 4  ;;  %v946_v27 = vadd.f32 %v945_v25, %v944_v9 }
 0x11e   :  { %v911_v28 = vadd.f32 %v910_v26, %v909_v24  ;;  %v947_v29 = vrot.slane %v946_v27, 4 }
 0x120   :  { %v912_v30 = vrot.slane %v911_v28, 2  ;;  %v948_v31 = vadd.f32 %v947_v29, %v946_v27 }
 0x122   :  { %v913_v32 = vadd.f32 %v912_v30, %v911_v28  ;;  %v949_v33 = vrot.slane %v948_v31, 2 }
 0x124   :  { %v914_v34 = vrot.slane %v913_v32, 1  ;;  %v950_v35 = vadd.f32 %v949_v33, %v948_v31 }
 0x126   :  { %v915_v36 = vadd.f32 %v914_v34, %v913_v32  ;;  %v951_v37 = vrot.slane %v950_v35, 1 }
 0x128   :  { %917 = vst.msk [vmem:[%s1443_s6] sm:$0x1] %vm916_vm3, %v915_v36  ;;  %v952_v38 = vadd.f32 %v951_v37, %v950_v35 }
 0x12a   :  { %953 = vst.msk [vmem:[%s1444_s7] sm:$0x1] %vm916_vm3, %v952_v38 }

// kernel: encoder_layer_forward.4
= control target key start
LH: loop header
LB: loop body
LE: loop exit
PB: predicated region body
PF: predicated region fallthrough
CT: control target
= control target key end

     0   :  { %vm77_vm0 = vcmask 123904   ;;  %v1293_v3 = vmov 0.0   ;;  %vm82_vm1 = vcmask 130048   ;;  %vm964_vm2 = vcmask 122880   ;;  %s1551_s3 = inlined_call_operand.vmem [shape: f32[5,16,16], index: 3, kind: input, shape index: {}]   ;;  %s1552_s0 = inlined_call_operand.vmem [shape: f32[2,40,16], index: 0, kind: input, shape index: {}]   ;;  %s1553_s1 = inlined_call_operand.vmem [shape: f32[1,16], index: 1, kind: input, shape index: {}]   ;;  %s1554_s2 = inlined_call_operand.vmem [shape: f32[1,16], index: 2, kind: input, shape index: {}]   ;;  %s1555_s4 = inlined_call_operand.vmem [shape: f32[1,16], index: 4, kind: input, shape index: {}]   ;;  %s1556_s5 = inlined_call_operand.vmem [shape: f32[2,40,16], index: 5, kind: output, shape index: {0}]   ;;  %s1557_s6 = inlined_call_operand.vmem [shape: f32[1,16], index: 6, kind: output, shape index: {1}]   ;;  %s1558_s7 = inlined_call_operand.vmem [shape: f32[1,16], index: 7, kind: output, shape index: {2}]  }
   0x1   :  { %v1038_v0 = vld [vmem:[%s1551_s3 + $0x20] sm:$0xff]  ;;  %v1039_v1 = vld [vmem:[%s1551_s3 + $0x28] sm:$0xff]  ;;  %v1016_v2 = vld [vmem:[%s1551_s3 + $0x10] sm:$0xff]  ;;  %78 = vst.msk [vmem:[#allocation2] sm:$0x3] %vm77_vm0, %v1293_v3 }
   0x2   :  { %79 = vst.msk [vmem:[#allocation2 + $0x30] sm:$0x3] %vm77_vm0, %v1293_v3  ;;  %80 = vst.msk [vmem:[#allocation2 + $0x2a] sm:$0x3] %vm77_vm0, %v1293_v3  ;;  %v1343_v4 = vpack.c.bf16 %v1039_v1, %v1038_v0  ;;  %v1017_v5 = vld [vmem:[%s1551_s3 + $0x18] sm:$0xff]  ;;  %v23_v6 = vld [vmem:[%s1552_s0] sm:$0xff] }
   0x3   :  { %81 = vst.msk [vmem:[#allocation2 + $0x5a] sm:$0x3] %vm77_vm0, %v1293_v3  ;;  %v1014_v7 = vld [vmem:[%s1553_s1] ss:$0 sm:$0xff]  ;;  %v1230_v8 = vpack.c.bf16 %v1017_v5, %v1016_v2  ;;  %v1050_v11 = vld [vmem:[%s1551_s3 + $0x30] sm:$0xff]  ;;  %v1051_v12 = vld [vmem:[%s1551_s3 + $0x38] sm:$0xff] }
   0x4   :  { %v40_v9 = vmul.f32 %v1014_v7, %v23_v6  ;;  %v1015_v10 = vld [vmem:[%s1554_s2] ss:$0 sm:$0xff]  ;;  %1239 = vmatprep.subr.bf16.mxu0 %v1343_v4  ;;  %v1364_v13 = vpack.c.bf16 %v1051_v12, %v1050_v11  ;;  %v24_v14 = vld [vmem:[%s1552_s0 + $0x8] sm:$0xff]  ;;  %v25_v15 = vld [vmem:[%s1552_s0 + $0x10] sm:$0xff] }
   0x5   :  { %v103_v16 = vld [vmem:[%s1551_s3] sm:$0xff]  ;;  %1231 = vmatprep.subr.bf16.mxu1 %v1230_v8  ;;  %1241 = vmatpush3.bf16.msra.mxu0 %v1343_v4  ;;  %v41_v18 = vmul.f32 %v1014_v7, %v24_v14  ;;  %v42_v19 = vmul.f32 %v1014_v7, %v25_v15  ;;  %v104_v20 = vld [vmem:[%s1551_s3 + $0x8] sm:$0xff]  ;;  %v26_v21 = vld [vmem:[%s1552_s0 + $0x18] sm:$0xff] }
   0x6   :  { %v57_v17 = vadd.f32 %v1015_v10, %v40_v9  ;;  %v27_v22 = vld [vmem:[%s1552_s0 + $0x20] sm:$0xff]  ;;  %1233 = vmatpush3.bf16.msra.mxu1 %v1230_v8  ;;  %1243 = vmatprep.subr.bf16.mxu0 %v1364_v13  ;;  %v1234_v23 = vpack.c.bf16 %v104_v20, %v103_v16  ;;  %v43_v24 = vmul.f32 %v1014_v7, %v26_v21  ;;  %v28_v26 = vld [vmem:[%s1552_s0 + $0x28] sm:$0xff]  ;;  %v29_v27 = vld [vmem:[%s1552_s0 + $0x30] sm:$0xff] }
   0x7   :  { %v44_v25 = vmul.f32 %v1014_v7, %v27_v22  ;;  %v58_v29 = vadd.f32 %v1015_v10, %v41_v18  ;;  %v59_v30 = vadd.f32 %v1015_v10, %v42_v19  ;;  %v45_v31 = vmul.f32 %v1014_v7, %v28_v26  ;;  %v30_v32 = vld [vmem:[%s1552_s0 + $0x38] sm:$0xff]  ;;  %v31_v33 = vld [vmem:[%s1552_s0 + $0x40] sm:$0xff]  ;;  %v32_v37 = vld [vmem:[%s1552_s0 + $0x48] sm:$0xff] }
   0x8   :  { %v67_v28 = vmax.f32 %v57_v17, 0.0  ;;  %1235 = vmatprep.subr.bf16.mxu1 %v1234_v23  ;;  %v60_v34 = vadd.f32 %v1015_v10, %v43_v24  ;;  %v46_v36 = vmul.f32 %v1014_v7, %v29_v27  ;;  %v47_v41 = vmul.f32 %v1014_v7, %v30_v32  ;;  %v1062_v54 = vld [vmem:[%s1551_s3 + $0x40] sm:$0xff]  ;;  %v1063_v55 = vld [vmem:[%s1551_s3 + $0x48] sm:$0xff] }
   0x9   :  { %v61_v35 = vadd.f32 %v1015_v10, %v44_v25  ;;  %v68_v38 = vmax.f32 %v58_v29, 0.0  ;;  %v69_v39 = vmax.f32 %v59_v30, 0.0  ;;  %v62_v40 = vadd.f32 %v1015_v10, %v45_v31 }
   0xa   :  { %83 = vst.msk [vmem:[#allocation2 + $0x2] sm:$0xff] %vm82_vm1, %v67_v28  ;;  %v70_v42 = vmax.f32 %v60_v34, 0.0  ;;  %v63_v44 = vadd.f32 %v1015_v10, %v46_v36  ;;  %v48_v45 = vmul.f32 %v1014_v7, %v31_v33  ;;  %v64_v47 = vadd.f32 %v1015_v10, %v47_v41 }
   0xb   :  { %v71_v43 = vmax.f32 %v61_v35, 0.0  ;;  %84 = vst.msk [vmem:[#allocation2 + $0xa] sm:$0xff] %vm82_vm1, %v68_v38  ;;  %85 = vst.msk [vmem:[#allocation2 + $0x12] sm:$0xff] %vm82_vm1, %v69_v39  ;;  %v72_v46 = vmax.f32 %v62_v40, 0.0  ;;  %v49_v48 = vmul.f32 %v1014_v7, %v32_v37  ;;  %v1246_v62 = vpack.c.bf16 %v1063_v55, %v1062_v54 }
   0xc   :  { %86 = vst.msk [vmem:[#allocation2 + $0x1a] sm:$0xff] %vm82_vm1, %v70_v42  ;;  %v73_v49 = vmax.f32 %v63_v44, 0.0  ;;  %v65_v50 = vadd.f32 %v1015_v10, %v48_v45  ;;  %v74_v51 = vmax.f32 %v64_v47, 0.0 }
   0xd   :  { %87 = vst.msk [vmem:[#allocation2 + $0x22] sm:$0xff] %vm82_vm1, %v71_v43  ;;  %88 = vst.msk [vmem:[#allocation2 + $0x32] sm:$0xff] %vm82_vm1, %v72_v46  ;;  %v66_v52 = vadd.f32 %v1015_v10, %v49_v48 }
   0xe   :  { %89 = vst.msk [vmem:[#allocation2 + $0x3a] sm:$0xff] %vm82_vm1, %v73_v49  ;;  %v75_v53 = vmax.f32 %v65_v50, 0.0  ;;  %90 = vst.msk [vmem:[#allocation2 + $0x42] sm:$0xff] %vm82_vm1, %v74_v51  ;;  %v1473_v51 = vld [vmem:[%s1555_s4] ss:$0 sm:$0xff] }
   0xf   :  { %v76_v56 = vmax.f32 %v66_v52, 0.0 }
  0x10   :  { %91 = vst.msk [vmem:[#allocation2 + $0x4a] sm:$0xff] %vm82_vm1, %v75_v53 }
  0x11   :  { %v105_v57 = vld [vmem:[#allocation2 + $0x1] sm:$0xff]  ;;  %92 = vst.msk [vmem:[#allocation2 + $0x52] sm:$0xff] %vm82_vm1, %v76_v56 }
  0x12   :  { %v408_v58 = vld [vmem:[#allocation2 + $0x2] sm:$0xff]  ;;  %1139 = vmatprep.mubr.msk.f32.mxu1 %vm82_vm1, %v105_v57  ;;  %v409_v60 = vld [vmem:[#allocation2 + $0xa] sm:$0xff]  ;;  %v410_v63 = vld [vmem:[#allocation2 + $0x12] sm:$0xff] }
  0x13   :  { %1177 = vmatprep.mubr.msk.f32.mxu0 %vm82_vm1, %v408_v58  ;;  %v106_v59 = vld [vmem:[#allocation2 + $0x9] sm:$0xff]  ;;  %v107_v61 = vld [vmem:[#allocation2 + $0x11] sm:$0xff]  ;;  %v108_v0 = vld [vmem:[#allocation2 + $0x19] sm:$0xff] }
  0x14   :  { %1140 = vmatmul.mubr.msk.f32.vlgmr.msra.gmra.mrb[0].mxu1 %vm82_vm1, %v106_v59  ;;  %1178 = vmatmul.mubr.msk.f32.vlgmr.msra.gmra.mrb[0].mxu0 %vm82_vm1, %v409_v60  ;;  %v411_v1 = vld [vmem:[#allocation2 + $0x1a] sm:$0xff]  ;;  %v412_v3 = vld [vmem:[#allocation2 + $0x22] sm:$0xff]  ;;  %v110_v5 = vld [vmem:[#allocation2 + $0x31] sm:$0xff] }
  0x15   :  { %1245 = vmatpush3.bf16.msra.mxu0 %v1364_v13  ;;  %1142 = vmatprep.mubr.msk.f32.mxu1 %vm82_vm1, %v107_v61  ;;  %v109_v2 = vld [vmem:[#allocation2 + $0x21] sm:$0xff]  ;;  %v413_v6 = vld [vmem:[#allocation2 + $0x32] sm:$0xff] }
  0x16   :  { %1180 = vmatprep.mubr.msk.f32.mxu0 %vm82_vm1, %v410_v63  ;;  %1237 = vmatpush3.bf16.msra.mxu1 %v1234_v23  ;;  %v111_v7 = vld [vmem:[#allocation2 + $0x39] sm:$0xff]  ;;  %v576_v8 = vld [vmem:[#allocation2 + $0x3] sm:$0xff]  ;;  %v577_v10 = vld [vmem:[#allocation2 + $0xb] sm:$0xff] }
  0x17   :  { %1247 = vmatprep.subr.bf16.mxu0 %v1246_v62  ;;  %1250 = vmatprep.subr.bf16.mxu1 %v1343_v4  ;;  %v112_v9 = vld [vmem:[#allocation2 + $0x41] sm:$0xff]  ;;  %v113_v11 = vld [vmem:[#allocation2 + $0x49] sm:$0xff]  ;;  %v578_v12 = vld [vmem:[#allocation2 + $0x13] sm:$0xff] }
  0x18   :  { %1143 = vmatmul.mubr.msk.f32.gmra.mrb[2].mxu1 %vm82_vm1, %v108_v0  ;;  %1181 = vmatmul.mubr.msk.f32.gmra.mrb[2].mxu0 %vm82_vm1, %v411_v1  ;;  %v114_v13 = vld [vmem:[#allocation2 + $0x51] sm:$0xff]  ;;  %v579_v14 = vld [vmem:[#allocation2 + $0x1b] sm:$0xff]  ;;  %v580_v16 = vld [vmem:[#allocation2 + $0x23] sm:$0xff] }
  0x19   :  { %1145 = vmatprep.mubr.msk.f32.mxu1 %vm82_vm1, %v109_v2  ;;  %1183 = vmatprep.mubr.msk.f32.mxu0 %vm82_vm1, %v412_v3  ;;  %v93_v15 = vld [vmem:[#allocation2] sm:$0xff]  ;;  %v94_v17 = vld [vmem:[#allocation2 + $0x8] sm:$0xff]  ;;  %v581_v18 = vld [vmem:[#allocation2 + $0x33] sm:$0xff] }
  0x1a   :  { %v95_v19 = vld [vmem:[#allocation2 + $0x10] sm:$0xff]  ;;  %v582_v20 = vld [vmem:[#allocation2 + $0x3b] sm:$0xff]  ;;  %v583_v22 = vld [vmem:[#allocation2 + $0x43] sm:$0xff] }
  0x1b   :  { %v96_v21 = vld [vmem:[#allocation2 + $0x18] sm:$0xff]  ;;  %v97_v23 = vld [vmem:[#allocation2 + $0x20] sm:$0xff]  ;;  %v584_v24 = vld [vmem:[#allocation2 + $0x4b] sm:$0xff] }
  0x1c   :  { %1146 = vmatmul.mubr.msk.f32.gmra.mrb[4].mxu1 %vm82_vm1, %v110_v5  ;;  %1184 = vmatmul.mubr.msk.f32.gmra.mrb[4].mxu0 %vm82_vm1, %v413_v6  ;;  %v98_v25 = vld [vmem:[#allocation2 + $0x30] sm:$0xff]  ;;  %v99_v27 = vld [vmem:[#allocation2 + $0x38] sm:$0xff]  ;;  %v744_v28 = vld [vmem:[#allocation2 + $0x4] sm:$0xff] }
  0x1d   :  { %1148 = vmatprep.mubr.msk.f32.mxu1 %vm82_vm1, %v111_v7  ;;  %1196 = vmatprep.mubr.msk.f32.mxu0 %vm82_vm1, %v576_v8  ;;  %v585_v26 = vld [vmem:[#allocation2 + $0x53] sm:$0xff]  ;;  %v101_v30 = vld [vmem:[#allocation2 + $0x48] sm:$0xff]  ;;  %v747_v33 = vld [vmem:[#allocation2 + $0x1c] sm:$0xff] }
  0x1e   :  { %v745_v29 = vld [vmem:[#allocation2 + $0xc] sm:$0xff]  ;;  %v746_v31 = vld [vmem:[#allocation2 + $0x14] sm:$0xff]  ;;  %v748_v35 = vld [vmem:[#allocation2 + $0x24] sm:$0xff] }
  0x1f   :  { %v102_v32 = vld [vmem:[#allocation2 + $0x50] sm:$0xff]  ;;  %v414_v34 = vld [vmem:[#allocation2 + $0x3a] sm:$0xff]  ;;  %v415_v36 = vld [vmem:[#allocation2 + $0x42] sm:$0xff] }
  0x20   :  { %1149 = vmatmul.mubr.msk.f32.gmra.mrb[6].mxu1 %vm82_vm1, %v112_v9  ;;  %1197 = vmatmul.mubr.msk.f32.vlgmr.msra.gmra.mrb[0].mxu0 %vm82_vm1, %v577_v10  ;;  %v749_v37 = vld [vmem:[#allocation2 + $0x34] sm:$0xff]  ;;  %v416_v38 = vld [vmem:[#allocation2 + $0x4a] sm:$0xff]  ;;  %v750_v39 = vld [vmem:[#allocation2 + $0x3c] sm:$0xff] }
  0x21   :  { %1249 = vmatpush3.bf16.msra.mxu0 %v1246_v62  ;;  %1151 = vmatprep.mubr.msk.f32.mxu1 %vm82_vm1, %v113_v11  ;;  %v417_v40 = vld [vmem:[#allocation2 + $0x52] sm:$0xff]  ;;  %v751_v41 = vld [vmem:[#allocation2 + $0x44] sm:$0xff] }
  0x22   :  { %1199 = vmatprep.mubr.msk.f32.mxu0 %vm82_vm1, %v578_v12  ;;  %v752_v42 = vld [vmem:[#allocation2 + $0x4c] sm:$0xff]  ;;  %v753_v43 = vld [vmem:[#allocation2 + $0x54] sm:$0xff] }
  0x24   :  { %1152 = vmatmul.mubr.msk.f32.gmra.mrb[8].mxu1 %vm82_vm1, %v114_v13  ;;  %1200 = vmatmul.mubr.msk.f32.gmra.mrb[2].mxu0 %vm82_vm1, %v579_v14 }
  0x25   :  { %1158 = vmatprep.mubr.msk.f32.mxu1 %vm82_vm1, %v93_v15  ;;  %1202 = vmatprep.mubr.msk.f32.mxu0 %vm82_vm1, %v580_v16 }
  0x28   :  { %1159 = vmatmul.mubr.msk.f32.vlgmr.msra.gmra.mrb[0].mxu1 %vm82_vm1, %v94_v17  ;;  %1203 = vmatmul.mubr.msk.f32.gmra.mrb[4].mxu0 %vm82_vm1, %v581_v18 }
  0x29   :  { %1161 = vmatprep.mubr.msk.f32.mxu1 %vm82_vm1, %v95_v19  ;;  %1205 = vmatprep.mubr.msk.f32.mxu0 %vm82_vm1, %v582_v20 }
  0x2a   :  { %1251 = vmatpush3.bf16.msra.mxu1 %v1343_v4  ;;  %v100_v4 = vld [vmem:[#allocation2 + $0x40] sm:$0xff] }
  0x2c   :  { %1162 = vmatmul.mubr.msk.f32.gmra.mrb[2].mxu1 %vm82_vm1, %v96_v21  ;;  %1206 = vmatmul.mubr.msk.f32.gmra.mrb[6].mxu0 %vm82_vm1, %v583_v22 }
  0x2d   :  { %1164 = vmatprep.mubr.msk.f32.mxu1 %vm82_vm1, %v97_v23  ;;  %1208 = vmatprep.mubr.msk.f32.mxu0 %vm82_vm1, %v584_v24 }
  0x30   :  { %1165 = vmatmul.mubr.msk.f32.gmra.mrb[4].mxu1 %vm82_vm1, %v98_v25  ;;  %1209 = vmatmul.mubr.msk.f32.gmra.mrb[8].mxu0 %vm82_vm1, %v585_v26 }
  0x31   :  { %1167 = vmatprep.mubr.msk.f32.mxu1 %vm82_vm1, %v99_v27  ;;  %1215 = vmatprep.mubr.msk.f32.mxu0 %vm82_vm1, %v744_v28 }
  0x34   :  { %1168 = vmatmul.mubr.msk.f32.gmra.mrb[6].mxu1 %vm82_vm1, %v100_v4  ;;  %1216 = vmatmul.mubr.msk.f32.vlgmr.msra.gmra.mrb[0].mxu0 %vm82_vm1, %v745_v29 }
  0x35   :  { %1170 = vmatprep.mubr.msk.f32.mxu1 %vm82_vm1, %v101_v30  ;;  %1218 = vmatprep.mubr.msk.f32.mxu0 %vm82_vm1, %v746_v31 }
  0x38   :  { %1171 = vmatmul.mubr.msk.f32.gmra.mrb[8].mxu1 %vm82_vm1, %v102_v32  ;;  %1219 = vmatmul.mubr.msk.f32.gmra.mrb[2].mxu0 %vm82_vm1, %v747_v33 }
  0x39   :  { %1186 = vmatprep.mubr.msk.f32.mxu1 %vm82_vm1, %v414_v34  ;;  %1221 = vmatprep.mubr.msk.f32.mxu0 %vm82_vm1, %v748_v35 }
  0x3c   :  { %1187 = vmatmul.mubr.msk.f32.vlgmr.msra.gmra.mrb[6].mxu1 %vm82_vm1, %v415_v36  ;;  %1222 = vmatmul.mubr.msk.f32.gmra.mrb[4].mxu0 %vm82_vm1, %v749_v37 }
  0x3d   :  { %1189 = vmatprep.mubr.msk.f32.mxu1 %vm82_vm1, %v416_v38  ;;  %1224 = vmatprep.mubr.msk.f32.mxu0 %vm82_vm1, %v750_v39 }
  0x40   :  { %1190 = vmatmul.mubr.msk.f32.gmra.mrb[8].mxu1 %vm82_vm1, %v417_v40  ;;  %1225 = vmatmul.mubr.msk.f32.gmra.mrb[6].mxu0 %vm82_vm1, %v751_v41 }
  0x41   :  { %1227 = vmatprep.mubr.msk.f32.mxu0 %vm82_vm1, %v752_v42 }
  0x44   :  { %1228 = vmatmul.mubr.msk.f32.gmra.mrb[8].mxu0 %vm82_vm1, %v753_v43 }
  0xfb   :  { %v1160_v44 = vpop.f32.mrb[0].mxu1 }
  0xfc   :  { %v359_v45 = vpop.f32.mrb[1].mxu1 }
  0xff   :  { %v1163_v46 = vpop.f32.mrb[2].mxu1 }
 0x100   :  { %v369_v47 = vpop.f32.mrb[3].mxu1 }
 0x103   :  { %v1166_v48 = vpop.f32.mrb[4].mxu1 }
 0x104   :  { %v379_v49 = vpop.f32.mrb[5].mxu1 }
 0x107   :  { %v1217_v50 = vpop.f32.mrb[0].mxu0 }
 0x108   :  { %v1252_v52 = vadd.f32 %v1217_v50, %v1160_v44  ;;  %v853_v53 = vpop.f32.mrb[1].mxu0 }
 0x109   :  { %v1253_v54 = vadd.f32 %v853_v53, %v359_v45 }
 0x10a   :  { %v920_v55 = vadd.f32 %v1252_v52, %v1473_v51 }
 0x10b   :  { %v919_v56 = vadd.f32 %v1253_v54, %v1473_v51  ;;  %v1220_v57 = vpop.f32.mrb[2].mxu0 }
 0x10c   :  { %930 = vst.msk [vmem:[%s1556_s5 + $0x8] sm:$0xff] %vm82_vm1, %v920_v55  ;;  %v940_v58 = vsel %vm82_vm1, %v920_v55, 0.0  ;;  %v967_v59 = vmul.f32 %v920_v55, %v920_v55  ;;  %v1254_v60 = vadd.f32 %v1220_v57, %v1163_v46  ;;  %v863_v61 = vpop.f32.mrb[3].mxu0 }
 0x10d   :  { %929 = vst.msk [vmem:[%s1556_s5] sm:$0xff] %vm82_vm1, %v919_v56  ;;  %v939_v62 = vsel %vm82_vm1, %v919_v56, 0.0  ;;  %v966_v63 = vmul.f32 %v919_v56, %v919_v56  ;;  %v1255_v0 = vadd.f32 %v863_v61, %v369_v47 }
 0x10e   :  { %v977_v1 = vsel %vm82_vm1, %v967_v59, 0.0  ;;  %v941_v2 = vadd.f32 %v940_v58, %v939_v62  ;;  %v922_v3 = vadd.f32 %v1254_v60, %v1473_v51 }
 0x10f   :  { %v976_v5 = vsel %vm82_vm1, %v966_v63, 0.0  ;;  %v921_v6 = vadd.f32 %v1255_v0, %v1473_v51  ;;  %v1188_v7 = vpop.f32.mrb[6].mxu1  ;;  %v1223_v8 = vpop.f32.mrb[4].mxu0 }
 0x110   :  { %v978_v9 = vadd.f32 %v977_v1, %v976_v5  ;;  %932 = vst.msk [vmem:[%s1556_s5 + $0x18] sm:$0xff] %vm82_vm1, %v922_v3  ;;  %v969_v10 = vmul.f32 %v922_v3, %v922_v3  ;;  %v1256_v11 = vadd.f32 %v1223_v8, %v1166_v48  ;;  %v547_v12 = vpop.f32.mrb[7].mxu1  ;;  %v873_v13 = vpop.f32.mrb[5].mxu0  ;;  %v944_v19 = vsel %vm82_vm1, %v922_v3, 0.0 }
 0x111   :  { %931 = vst.msk [vmem:[%s1556_s5 + $0x10] sm:$0xff] %vm82_vm1, %v921_v6  ;;  %v942_v14 = vsel %vm82_vm1, %v921_v6, 0.0  ;;  %v968_v15 = vmul.f32 %v921_v6, %v921_v6  ;;  %v1257_v16 = vadd.f32 %v873_v13, %v379_v49 }
 0x112   :  { %v943_v17 = vadd.f32 %v942_v14, %v941_v2  ;;  %v924_v18 = vadd.f32 %v1256_v11, %v1473_v51  ;;  %v981_v24 = vsel %vm82_vm1, %v969_v10, 0.0 }
 0x113   :  { %v979_v20 = vsel %vm82_vm1, %v968_v15, 0.0  ;;  %v923_v21 = vadd.f32 %v1257_v16, %v1473_v51  ;;  %v1191_v22 = vpop.f32.mrb[8].mxu1  ;;  %v1226_v23 = vpop.f32.mrb[6].mxu0 }
 0x114   :  { %v980_v25 = vadd.f32 %v979_v20, %v978_v9  ;;  %934 = vst.msk [vmem:[%s1556_s5 + $0x28] sm:$0xff] %vm82_vm1, %v924_v18  ;;  %v971_v26 = vmul.f32 %v924_v18, %v924_v18  ;;  %v945_v27 = vadd.f32 %v944_v19, %v943_v17  ;;  %v557_v28 = vpop.f32.mrb[9].mxu1  ;;  %v883_v4 = vpop.f32.mrb[7].mxu0  ;;  %v1258_v31 = vadd.f32 %v1226_v23, %v1188_v7 }
 0x115   :  { %933 = vst.msk [vmem:[%s1556_s5 + $0x20] sm:$0xff] %vm82_vm1, %v923_v21  ;;  %v946_v29 = vsel %vm82_vm1, %v923_v21, 0.0  ;;  %v970_v30 = vmul.f32 %v923_v21, %v923_v21  ;;  %v1259_v32 = vadd.f32 %v883_v4, %v547_v12  ;;  %v948_v35 = vsel %vm82_vm1, %v924_v18, 0.0 }
 0x116   :  { %v947_v33 = vadd.f32 %v946_v29, %v945_v27  ;;  %v982_v34 = vadd.f32 %v981_v24, %v980_v25  ;;  %v926_v37 = vadd.f32 %v1258_v31, %v1473_v51  ;;  %v985_v44 = vsel %vm82_vm1, %v971_v26, 0.0 }
 0x117   :  { %v983_v36 = vsel %vm82_vm1, %v970_v30, 0.0  ;;  %v925_v38 = vadd.f32 %v1259_v32, %v1473_v51  ;;  %v1229_v39 = vpop.f32.mrb[8].mxu0 }
 0x118   :  { %v984_v40 = vadd.f32 %v983_v36, %v982_v34  ;;  %v949_v41 = vadd.f32 %v948_v35, %v947_v33  ;;  %v1260_v42 = vadd.f32 %v1229_v39, %v1191_v22  ;;  %v893_v43 = vpop.f32.mrb[9].mxu0  ;;  %936 = vst.msk [vmem:[%s1556_s5 + $0x38] sm:$0xff] %vm82_vm1, %v926_v37  ;;  %v973_v45 = vmul.f32 %v926_v37, %v926_v37 }
 0x119   :  { %935 = vst.msk [vmem:[%s1556_s5 + $0x30] sm:$0xff] %vm82_vm1, %v925_v38  ;;  %v950_v46 = vsel %vm82_vm1, %v925_v38, 0.0  ;;  %v972_v47 = vmul.f32 %v925_v38, %v925_v38  ;;  %v1261_v52 = vadd.f32 %v893_v43, %v557_v28  ;;  %v952_v54 = vsel %vm82_vm1, %v926_v37, 0.0 }
 0x11a   :  { %v951_v48 = vadd.f32 %v950_v46, %v949_v41  ;;  %v986_v49 = vadd.f32 %v985_v44, %v984_v40  ;;  %v928_v50 = vadd.f32 %v1260_v42, %v1473_v51  ;;  %v989_v57 = vsel %vm82_vm1, %v973_v45, 0.0 }
 0x11b   :  { %v987_v53 = vsel %vm82_vm1, %v972_v47, 0.0  ;;  %v927_v56 = vadd.f32 %v1261_v52, %v1473_v51 }
 0x11c   :  { %v988_v55 = vadd.f32 %v987_v53, %v986_v49  ;;  %938 = vst.msk [vmem:[%s1556_s5 + $0x48] sm:$0xff] %vm82_vm1, %v928_v50  ;;  %v953_v58 = vadd.f32 %v952_v54, %v951_v48  ;;  %v975_v59 = vmul.f32 %v928_v50, %v928_v50  ;;  %v956_v0 = vsel %vm82_vm1, %v928_v50, 0.0 }
 0x11d   :  { %937 = vst.msk [vmem:[%s1556_s5 + $0x40] sm:$0xff] %vm82_vm1, %v927_v56  ;;  %v954_v60 = vsel %vm82_vm1, %v927_v56, 0.0  ;;  %v974_v61 = vmul.f32 %v927_v56, %v927_v56 }
 0x11e   :  { %v990_v62 = vadd.f32 %v989_v57, %v988_v55  ;;  %v955_v63 = vadd.f32 %v954_v60, %v953_v58  ;;  %v993_v3 = vsel %vm82_vm1, %v975_v59, 0.0 }
 0x11f   :  { %v991_v1 = vsel %vm82_vm1, %v974_v61, 0.0 }
 0x120   :  { %v957_v2 = vadd.f32 %v956_v0, %v955_v63  ;;  %v992_v51 = vadd.f32 %v991_v1, %v990_v62 }
 0x122   :  { %v958_v5 = vrot.slane %v957_v2, 4  ;;  %v994_v6 = vadd.f32 %v993_v3, %v992_v51 }
 0x124   :  { %v959_v7 = vadd.f32 %v958_v5, %v957_v2  ;;  %v995_v8 = vrot.slane %v994_v6, 4 }
 0x126   :  { %v960_v9 = vrot.slane %v959_v7, 2  ;;  %v996_v10 = vadd.f32 %v995_v8, %v994_v6 }
 0x128   :  { %v961_v11 = vadd.f32 %v960_v9, %v959_v7  ;;  %v997_v12 = vrot.slane %v996_v10, 2 }
 0x12a   :  { %v962_v13 = vrot.slane %v961_v11, 1  ;;  %v998_v14 = vadd.f32 %v997_v12, %v996_v10 }
 0x12c   :  { %v963_v15 = vadd.f32 %v962_v13, %v961_v11  ;;  %v999_v16 = vrot.slane %v998_v14, 1 }
 0x12e   :  { %965 = vst.msk [vmem:[%s1557_s6] sm:$0x1] %vm964_vm2, %v963_v15  ;;  %v1000_v17 = vadd.f32 %v999_v16, %v998_v14 }
 0x130   :  { %1001 = vst.msk [vmem:[%s1558_s7] sm:$0x1] %vm964_vm2, %v1000_v17 }

</bundles_post_ra>
